<compile_context>
chip_gen: v7x
topology: tpu7x:2x2x1
jax: 0.10.0
libtpu: 0.0.40
codegen_flags: <defaults>
</compile_context>

<pallas_src>
import functools
import math

import jax
import jax.numpy as jnp
from jax.experimental import pallas as pl
from jax.experimental.pallas import tpu as pltpu


# ----------------------------------------------------------------------------
# Fused Pallas kernel: full forward for one batch element per grid step
# ----------------------------------------------------------------------------

def _fused_forward_kernel(q_emb_ref, dpos_emb_ref, dneg_emb_ref,
                          q_keymask_ref, q_rowmask_ref,
                          dpos_rowmask_ref, dneg_rowmask_ref,
                          wq_ref, wk_ref, wv_ref, wo_ref,
                          glo_w_ref, glo_v_ref,
                          score_pos_ref, score_neg_ref,
                          *, num_heads, head_dim):
    scale = 1.0 / math.sqrt(head_dim)

    q_emb = q_emb_ref[0]                 # (Lq, E)  query tokens
    dpos_emb = dpos_emb_ref[0]           # (Ld, E)  positive doc tokens
    dneg_emb = dneg_emb_ref[0]           # (Ld, E)  negative doc tokens
    key_mask = q_keymask_ref[0]          # (1, Lq)  lane-major key mask (query)
    q_rowmask = q_rowmask_ref[0]         # (Lq, 1)
    dpos_rowmask = dpos_rowmask_ref[0]   # (Ld, 1)
    dneg_rowmask = dneg_rowmask_ref[0]   # (Ld, 1)

    glo_w = glo_w_ref[...]               # (E, Hd)
    glo_v = glo_v_ref[...]               # (Hd, 1)

    # K/V projections of the query tokens: computed ONCE, reused by all three
    # attention branches (d_pos, d_neg, and q self-attention).
    k_heads = [jnp.dot(q_emb, wk_ref[h], preferred_element_type=jnp.float32)
               for h in range(num_heads)]                         # H x (Lq, dk)
    v_heads = [jnp.dot(q_emb, wv_ref[h], preferred_element_type=jnp.float32)
               for h in range(num_heads)]                         # H x (Lq, dk)

    def mha_branch(x, row_mask):
        # x: (L, E) tokens that attend over the query tokens; returns (L, E).
        att = None
        for h in range(num_heads):  # static unrolled head loop
            qh = jnp.dot(x, wq_ref[h], preferred_element_type=jnp.float32)   # (L, dk)
            # scores (L, Lq) = qh @ k_h^T  (contraction over dk, no explicit transpose)
            s = jax.lax.dot_general(qh, k_heads[h], (((1,), (1,)), ((), ())),
                                    preferred_element_type=jnp.float32) * scale
            s = jnp.where(key_mask > 0.0, s, -1e9)        # mask padded query keys
            s = s - jnp.max(s, axis=-1, keepdims=True)
            p = jnp.exp(s)
            p = p * pl.reciprocal(jnp.sum(p, axis=-1, keepdims=True), approx=True)
            oh = jnp.dot(p, v_heads[h], preferred_element_type=jnp.float32)  # (L, dk)
            # head-concat + Wo fused:  concat_h(o_h) @ Wo == sum_h o_h @ Wo_h
            c = jnp.dot(oh, wo_ref[h], preferred_element_type=jnp.float32)   # (L, E)
            att = c if att is None else att + c
        # zero padded attendee rows (dropout of the torch module is identity here)
        return att * row_mask

    def glorep_pool(x):
        # Additive attention pooling: (L, E) -> (1, E).
        hsc = jnp.tanh(jnp.dot(x, glo_w, preferred_element_type=jnp.float32))  # (L, Hd)
        s = jnp.dot(hsc, glo_v, preferred_element_type=jnp.float32)            # (L, 1)
        s = s - jnp.max(s, axis=0, keepdims=True)
        a = jnp.exp(s)
        a = a * pl.reciprocal(jnp.sum(a, axis=0, keepdims=True), approx=True)
        return jnp.sum(a * x, axis=0, keepdims=True)

    def cos(a, b):
        num = jnp.sum(a * b, axis=-1, keepdims=True)
        na = jnp.sqrt(jnp.sum(a * a, axis=-1, keepdims=True))
        nb = jnp.sqrt(jnp.sum(b * b, axis=-1, keepdims=True))
        return num / jnp.maximum(na * nb, 1e-8)                                # (1, 1)

    d_pos_att = mha_branch(dpos_emb, dpos_rowmask)
    d_neg_att = mha_branch(dneg_emb, dneg_rowmask)
    q_att = mha_branch(q_emb, q_rowmask)

    d_pos_rep = glorep_pool(d_pos_att)
    d_neg_rep = glorep_pool(d_neg_att)
    q_rep = glorep_pool(q_att)

    score_pos_ref[0] = cos(q_rep, d_pos_rep).astype(score_pos_ref.dtype)
    score_neg_ref[0] = cos(q_rep, d_neg_rep).astype(score_neg_ref.dtype)


def fused_forward(q_emb, dpos_emb, dneg_emb,
                  q_key_mask, q_row_mask, dpos_row_mask, dneg_row_mask,
                  wq_h, wk_h, wv_h, wo_h, glo_w, glo_v, *, num_heads):
    BS, Lq, E = q_emb.shape
    Ld = dpos_emb.shape[1]
    dk = E // num_heads
    Hd = glo_w.shape[1]

    kernel = functools.partial(_fused_forward_kernel,
                               num_heads=num_heads, head_dim=dk)
    batched3 = lambda b: (b, 0, 0)
    const3 = lambda b: (0, 0, 0)
    const2 = lambda b: (0, 0)

    return pl.pallas_call(
        kernel,
        out_shape=(jax.ShapeDtypeStruct((BS, 1, 1), jnp.float32),
                   jax.ShapeDtypeStruct((BS, 1, 1), jnp.float32)),
        grid=(BS,),
        in_specs=[
            pl.BlockSpec((1, Lq, E), batched3),          # q_emb
            pl.BlockSpec((1, Ld, E), batched3),          # dpos_emb
            pl.BlockSpec((1, Ld, E), batched3),          # dneg_emb
            pl.BlockSpec((1, 1, Lq), batched3),          # q key mask (lane-major)
            pl.BlockSpec((1, Lq, 1), batched3),          # q row mask
            pl.BlockSpec((1, Ld, 1), batched3),          # dpos row mask
            pl.BlockSpec((1, Ld, 1), batched3),          # dneg row mask
            pl.BlockSpec((num_heads, E, dk), const3),    # Wq per head
            pl.BlockSpec((num_heads, E, dk), const3),    # Wk per head
            pl.BlockSpec((num_heads, E, dk), const3),    # Wv per head
            pl.BlockSpec((num_heads, dk, E), const3),    # Wo per head
            pl.BlockSpec((E, Hd), const2),               # GloRep W
            pl.BlockSpec((Hd, 1), const2),               # GloRep v
        ],
        out_specs=(pl.BlockSpec((1, 1, 1), batched3),
                   pl.BlockSpec((1, 1, 1), batched3)),
        compiler_params=pltpu.CompilerParams(dimension_semantics=("parallel",)),
    )(q_emb, dpos_emb, dneg_emb,
      q_key_mask, q_row_mask, dpos_row_mask, dneg_row_mask,
      wq_h, wk_h, wv_h, wo_h, glo_w, glo_v)


# ----------------------------------------------------------------------------
# Model glue (parameter init + forward orchestration)
# ----------------------------------------------------------------------------

def init_params(key, vocab_size, emb_size, hidden_size):
    ks = jax.random.split(key, 7)
    s_e = 1.0 / math.sqrt(emb_size)
    s_h = 1.0 / math.sqrt(hidden_size)
    return {
        # Embedding weight ~ N(0, 0.005) as in the PyTorch __init__ (preemb=False).
        "emb": 0.005 * jax.random.normal(ks[0], (vocab_size, emb_size), jnp.float32),
        "Wq": s_e * jax.random.normal(ks[1], (emb_size, emb_size), jnp.float32),
        "Wk": s_e * jax.random.normal(ks[2], (emb_size, emb_size), jnp.float32),
        "Wv": s_e * jax.random.normal(ks[3], (emb_size, emb_size), jnp.float32),
        "Wo": s_e * jax.random.normal(ks[4], (emb_size, emb_size), jnp.float32),
        "glo_W": s_e * jax.random.normal(ks[5], (emb_size, hidden_size), jnp.float32),
        "glo_v": s_h * jax.random.normal(ks[6], (hidden_size, 1), jnp.float32),
    }


def attention_forward(params, q_ids, dpos_ids, dneg_ids,
                      q_mask, dpos_mask, dneg_mask, *, num_heads):
    emb = params["emb"]
    E = emb.shape[1]
    assert E % num_heads == 0
    dk = E // num_heads

    # Glue: embedding gather (data-dependent gather kept in JAX).
    q_emb = jnp.take(emb, q_ids, axis=0)        # (BS, qlen, E)
    dpos_emb = jnp.take(emb, dpos_ids, axis=0)  # (BS, dlen, E)
    dneg_emb = jnp.take(emb, dneg_ids, axis=0)  # (BS, dlen, E)

    # Per-head weight views so the kernel never reshapes/transposes in-register.
    wq_h = params["Wq"].reshape(E, num_heads, dk).transpose(1, 0, 2)  # (H, E, dk)
    wk_h = params["Wk"].reshape(E, num_heads, dk).transpose(1, 0, 2)
    wv_h = params["Wv"].reshape(E, num_heads, dk).transpose(1, 0, 2)
    wo_h = params["Wo"].reshape(num_heads, dk, E)                     # (H, dk, E)

    # Lane-major key mask (broadcasts along lanes into the score tile).
    q_key_mask = jnp.transpose(q_mask, (0, 2, 1))                     # (BS, 1, qlen)

    sp, sn = fused_forward(
        q_emb, dpos_emb, dneg_emb,
        q_key_mask, q_mask, dpos_mask, dneg_mask,
        wq_h, wk_h, wv_h, wo_h,
        params["glo_W"], params["glo_v"],
        num_heads=num_heads)
    return sp[:, 0, 0], sn[:, 0, 0]


# ----------------------------------------------------------------------------
# Demo
# ----------------------------------------------------------------------------

if __name__ == "__main__":
    BS, qlen, dlen = 2, 8, 16
    emb_size, num_heads, hidden_size, vocab_size = 32, 4, 32, 50

    key = jax.random.PRNGKey(0)
    kp, kq, kdp, kdn = jax.random.split(key, 4)
    params = init_params(kp, vocab_size, emb_size, hidden_size)

    q_ids = jax.random.randint(kq, (BS, qlen), 1, vocab_size, dtype=jnp.int32)
    dpos_ids = jax.random.randint(kdp, (BS, dlen), 1, vocab_size, dtype=jnp.int32)
    dneg_ids = jax.random.randint(kdn, (BS, dlen), 1, vocab_size, dtype=jnp.int32)
    # introduce some padding (id 0) so the masks are exercised
    q_ids = q_ids.at[:, -2:].set(0)
    dpos_ids = dpos_ids.at[:, -3:].set(0)
    dneg_ids = dneg_ids.at[:, -4:].set(0)

    # generate_mask(): nonzero token -> 1.0, shape (BS, L, 1)
    q_mask = (q_ids != 0).astype(jnp.float32)[..., None]
    dpos_mask = (dpos_ids != 0).astype(jnp.float32)[..., None]
    dneg_mask = (dneg_ids != 0).astype(jnp.float32)[..., None]

    forward = jax.jit(functools.partial(attention_forward, num_heads=num_heads))
    score_pos, score_neg = forward(params, q_ids, dpos_ids, dneg_ids,
                                   q_mask, dpos_mask, dneg_mask)
    jax.block_until_ready((score_pos, score_neg))

    assert score_pos.shape == (BS,) and score_neg.shape == (BS,)
    assert bool(jnp.all(jnp.isfinite(score_pos))) and bool(jnp.all(jnp.isfinite(score_neg)))
    print("KERNEL_OK")
</pallas_src>

<mosaic_0001>
module attributes {stable_mosaic.version = 11 : i64} {
  func.func @_fused_forward_kernel(%arg0: i32, %arg1: memref<1x8x32xf32, #tpu.memory_space<vmem>>, %arg2: memref<1x16x32xf32, #tpu.memory_space<vmem>>, %arg3: memref<1x16x32xf32, #tpu.memory_space<vmem>>, %arg4: memref<1x1x8xf32, #tpu.memory_space<vmem>>, %arg5: memref<1x8x1xf32, #tpu.memory_space<vmem>>, %arg6: memref<1x16x1xf32, #tpu.memory_space<vmem>>, %arg7: memref<1x16x1xf32, #tpu.memory_space<vmem>>, %arg8: memref<4x32x8xf32, #tpu.memory_space<vmem>>, %arg9: memref<4x32x8xf32, #tpu.memory_space<vmem>>, %arg10: memref<4x32x8xf32, #tpu.memory_space<vmem>>, %arg11: memref<4x8x32xf32, #tpu.memory_space<vmem>>, %arg12: memref<32x32xf32, #tpu.memory_space<vmem>>, %arg13: memref<32x1xf32, #tpu.memory_space<vmem>>, %arg14: memref<1x1x1xf32, #tpu.memory_space<vmem>>, %arg15: memref<1x1x1xf32, #tpu.memory_space<vmem>>) attributes {dimension_semantics = [#tpu.dimension_semantics<parallel>], iteration_bounds = array<i64: 2>, scalar_prefetch = 0 : i64, scratch_operands = 0 : i64, tpu.core_type = #tpu.core_type<tc>, window_params = [{transform_indices = @transform_0, window_bounds = array<i64: 1, 8, 32>}, {transform_indices = @transform_1, window_bounds = array<i64: 1, 16, 32>}, {transform_indices = @transform_2, window_bounds = array<i64: 1, 16, 32>}, {transform_indices = @transform_3, window_bounds = array<i64: 1, 1, 8>}, {transform_indices = @transform_4, window_bounds = array<i64: 1, 8, 1>}, {transform_indices = @transform_5, window_bounds = array<i64: 1, 16, 1>}, {transform_indices = @transform_6, window_bounds = array<i64: 1, 16, 1>}, {pipeline_mode = #tpu.pipeline_mode<synchronous>, transform_indices = @transform_7, window_bounds = array<i64: 4, 32, 8>}, {pipeline_mode = #tpu.pipeline_mode<synchronous>, transform_indices = @transform_8, window_bounds = array<i64: 4, 32, 8>}, {pipeline_mode = #tpu.pipeline_mode<synchronous>, transform_indices = @transform_9, window_bounds = array<i64: 4, 32, 8>}, {pipeline_mode = #tpu.pipeline_mode<synchronous>, transform_indices = @transform_10, window_bounds = array<i64: 4, 8, 32>}, {pipeline_mode = #tpu.pipeline_mode<synchronous>, transform_indices = @transform_11, window_bounds = array<i64: 32, 32>}, {pipeline_mode = #tpu.pipeline_mode<synchronous>, transform_indices = @transform_12, window_bounds = array<i64: 32, 1>}, {transform_indices = @transform_13, window_bounds = array<i64: 1, 1, 1>}, {transform_indices = @transform_14, window_bounds = array<i64: 1, 1, 1>}]} {
    %c0 = arith.constant 0 : index
    %c0_0 = arith.constant 0 : index
    %c0_1 = arith.constant 0 : index
    %0 = vector.load %arg1[%c0, %c0_0, %c0_1] : memref<1x8x32xf32, #tpu.memory_space<vmem>>, vector<1x8x32xf32>
    %1 = vector.shape_cast %0 : vector<1x8x32xf32> to vector<8x32xf32>
    %c0_2 = arith.constant 0 : index
    %c0_3 = arith.constant 0 : index
    %c0_4 = arith.constant 0 : index
    %2 = vector.load %arg2[%c0_2, %c0_3, %c0_4] : memref<1x16x32xf32, #tpu.memory_space<vmem>>, vector<1x16x32xf32>
    %3 = vector.shape_cast %2 : vector<1x16x32xf32> to vector<16x32xf32>
    %c0_5 = arith.constant 0 : index
    %c0_6 = arith.constant 0 : index
    %c0_7 = arith.constant 0 : index
    %4 = vector.load %arg3[%c0_5, %c0_6, %c0_7] : memref<1x16x32xf32, #tpu.memory_space<vmem>>, vector<1x16x32xf32>
    %5 = vector.shape_cast %4 : vector<1x16x32xf32> to vector<16x32xf32>
    %c0_8 = arith.constant 0 : index
    %c0_9 = arith.constant 0 : index
    %c0_10 = arith.constant 0 : index
    %6 = vector.load %arg4[%c0_8, %c0_9, %c0_10] : memref<1x1x8xf32, #tpu.memory_space<vmem>>, vector<1x1x8xf32>
    %7 = vector.shape_cast %6 : vector<1x1x8xf32> to vector<1x8xf32>
    %c0_11 = arith.constant 0 : index
    %c0_12 = arith.constant 0 : index
    %c0_13 = arith.constant 0 : index
    %8 = vector.load %arg5[%c0_11, %c0_12, %c0_13] : memref<1x8x1xf32, #tpu.memory_space<vmem>>, vector<1x8x1xf32>
    %9 = vector.shape_cast %8 : vector<1x8x1xf32> to vector<8x1xf32>
    %c0_14 = arith.constant 0 : index
    %c0_15 = arith.constant 0 : index
    %c0_16 = arith.constant 0 : index
    %10 = vector.load %arg6[%c0_14, %c0_15, %c0_16] : memref<1x16x1xf32, #tpu.memory_space<vmem>>, vector<1x16x1xf32>
    %11 = vector.shape_cast %10 : vector<1x16x1xf32> to vector<16x1xf32>
    %c0_17 = arith.constant 0 : index
    %c0_18 = arith.constant 0 : index
    %c0_19 = arith.constant 0 : index
    %12 = vector.load %arg7[%c0_17, %c0_18, %c0_19] : memref<1x16x1xf32, #tpu.memory_space<vmem>>, vector<1x16x1xf32>
    %13 = vector.shape_cast %12 : vector<1x16x1xf32> to vector<16x1xf32>
    %c0_20 = arith.constant 0 : index
    %c0_21 = arith.constant 0 : index
    %14 = vector.load %arg12[%c0_20, %c0_21] : memref<32x32xf32, #tpu.memory_space<vmem>>, vector<32x32xf32>
    %c0_22 = arith.constant 0 : index
    %c0_23 = arith.constant 0 : index
    %15 = vector.load %arg13[%c0_22, %c0_23] : memref<32x1xf32, #tpu.memory_space<vmem>>, vector<32x1xf32>
    %c0_24 = arith.constant 0 : index
    %c0_25 = arith.constant 0 : index
    %c0_26 = arith.constant 0 : index
    %16 = vector.load %arg9[%c0_24, %c0_25, %c0_26] : memref<4x32x8xf32, #tpu.memory_space<vmem>>, vector<1x32x8xf32>
    %17 = vector.shape_cast %16 : vector<1x32x8xf32> to vector<32x8xf32>
    %cst = arith.constant dense<0.000000e+00> : vector<8x8xf32>
    %18 = tpu.matmul %1, %17, %cst {dimension_numbers = #tpu.dot_dimension_numbers<[1], [0], [0], [1], [0, 0, 1, 1], [], []>} : vector<8x32xf32>, vector<32x8xf32>, vector<8x8xf32> -> vector<8x8xf32>
    %c1 = arith.constant 1 : index
    %c0_27 = arith.constant 0 : index
    %c0_28 = arith.constant 0 : index
    %19 = vector.load %arg9[%c1, %c0_27, %c0_28] : memref<4x32x8xf32, #tpu.memory_space<vmem>>, vector<1x32x8xf32>
    %20 = vector.shape_cast %19 : vector<1x32x8xf32> to vector<32x8xf32>
    %cst_29 = arith.constant dense<0.000000e+00> : vector<8x8xf32>
    %21 = tpu.matmul %1, %20, %cst_29 {dimension_numbers = #tpu.dot_dimension_numbers<[1], [0], [0], [1], [0, 0, 1, 1], [], []>} : vector<8x32xf32>, vector<32x8xf32>, vector<8x8xf32> -> vector<8x8xf32>
    %c2 = arith.constant 2 : index
    %c0_30 = arith.constant 0 : index
    %c0_31 = arith.constant 0 : index
    %22 = vector.load %arg9[%c2, %c0_30, %c0_31] : memref<4x32x8xf32, #tpu.memory_space<vmem>>, vector<1x32x8xf32>
    %23 = vector.shape_cast %22 : vector<1x32x8xf32> to vector<32x8xf32>
    %cst_32 = arith.constant dense<0.000000e+00> : vector<8x8xf32>
    %24 = tpu.matmul %1, %23, %cst_32 {dimension_numbers = #tpu.dot_dimension_numbers<[1], [0], [0], [1], [0, 0, 1, 1], [], []>} : vector<8x32xf32>, vector<32x8xf32>, vector<8x8xf32> -> vector<8x8xf32>
    %c3 = arith.constant 3 : index
    %c0_33 = arith.constant 0 : index
    %c0_34 = arith.constant 0 : index
    %25 = vector.load %arg9[%c3, %c0_33, %c0_34] : memref<4x32x8xf32, #tpu.memory_space<vmem>>, vector<1x32x8xf32>
    %26 = vector.shape_cast %25 : vector<1x32x8xf32> to vector<32x8xf32>
    %cst_35 = arith.constant dense<0.000000e+00> : vector<8x8xf32>
    %27 = tpu.matmul %1, %26, %cst_35 {dimension_numbers = #tpu.dot_dimension_numbers<[1], [0], [0], [1], [0, 0, 1, 1], [], []>} : vector<8x32xf32>, vector<32x8xf32>, vector<8x8xf32> -> vector<8x8xf32>
    %c0_36 = arith.constant 0 : index
    %c0_37 = arith.constant 0 : index
    %c0_38 = arith.constant 0 : index
    %28 = vector.load %arg10[%c0_36, %c0_37, %c0_38] : memref<4x32x8xf32, #tpu.memory_space<vmem>>, vector<1x32x8xf32>
    %29 = vector.shape_cast %28 : vector<1x32x8xf32> to vector<32x8xf32>
    %cst_39 = arith.constant dense<0.000000e+00> : vector<8x8xf32>
    %30 = tpu.matmul %1, %29, %cst_39 {dimension_numbers = #tpu.dot_dimension_numbers<[1], [0], [0], [1], [0, 0, 1, 1], [], []>} : vector<8x32xf32>, vector<32x8xf32>, vector<8x8xf32> -> vector<8x8xf32>
    %c1_40 = arith.constant 1 : index
    %c0_41 = arith.constant 0 : index
    %c0_42 = arith.constant 0 : index
    %31 = vector.load %arg10[%c1_40, %c0_41, %c0_42] : memref<4x32x8xf32, #tpu.memory_space<vmem>>, vector<1x32x8xf32>
    %32 = vector.shape_cast %31 : vector<1x32x8xf32> to vector<32x8xf32>
    %cst_43 = arith.constant dense<0.000000e+00> : vector<8x8xf32>
    %33 = tpu.matmul %1, %32, %cst_43 {dimension_numbers = #tpu.dot_dimension_numbers<[1], [0], [0], [1], [0, 0, 1, 1], [], []>} : vector<8x32xf32>, vector<32x8xf32>, vector<8x8xf32> -> vector<8x8xf32>
    %c2_44 = arith.constant 2 : index
    %c0_45 = arith.constant 0 : index
    %c0_46 = arith.constant 0 : index
    %34 = vector.load %arg10[%c2_44, %c0_45, %c0_46] : memref<4x32x8xf32, #tpu.memory_space<vmem>>, vector<1x32x8xf32>
    %35 = vector.shape_cast %34 : vector<1x32x8xf32> to vector<32x8xf32>
    %cst_47 = arith.constant dense<0.000000e+00> : vector<8x8xf32>
    %36 = tpu.matmul %1, %35, %cst_47 {dimension_numbers = #tpu.dot_dimension_numbers<[1], [0], [0], [1], [0, 0, 1, 1], [], []>} : vector<8x32xf32>, vector<32x8xf32>, vector<8x8xf32> -> vector<8x8xf32>
    %c3_48 = arith.constant 3 : index
    %c0_49 = arith.constant 0 : index
    %c0_50 = arith.constant 0 : index
    %37 = vector.load %arg10[%c3_48, %c0_49, %c0_50] : memref<4x32x8xf32, #tpu.memory_space<vmem>>, vector<1x32x8xf32>
    %38 = vector.shape_cast %37 : vector<1x32x8xf32> to vector<32x8xf32>
    %cst_51 = arith.constant dense<0.000000e+00> : vector<8x8xf32>
    %39 = tpu.matmul %1, %38, %cst_51 {dimension_numbers = #tpu.dot_dimension_numbers<[1], [0], [0], [1], [0, 0, 1, 1], [], []>} : vector<8x32xf32>, vector<32x8xf32>, vector<8x8xf32> -> vector<8x8xf32>
    %c0_52 = arith.constant 0 : index
    %c0_53 = arith.constant 0 : index
    %c0_54 = arith.constant 0 : index
    %40 = vector.load %arg8[%c0_52, %c0_53, %c0_54] : memref<4x32x8xf32, #tpu.memory_space<vmem>>, vector<1x32x8xf32>
    %41 = vector.shape_cast %40 : vector<1x32x8xf32> to vector<32x8xf32>
    %cst_55 = arith.constant dense<0.000000e+00> : vector<16x8xf32>
    %42 = tpu.matmul %3, %41, %cst_55 {dimension_numbers = #tpu.dot_dimension_numbers<[1], [0], [0], [1], [0, 0, 1, 1], [], []>} : vector<16x32xf32>, vector<32x8xf32>, vector<16x8xf32> -> vector<16x8xf32>
    %cst_56 = arith.constant dense<0.000000e+00> : vector<16x8xf32>
    %43 = tpu.matmul %42, %18, %cst_56 {dimension_numbers = #tpu.dot_dimension_numbers<[1], [1], [0], [0], [0, 0, 1, 0], [], []>} : vector<16x8xf32>, vector<8x8xf32>, vector<16x8xf32> -> vector<16x8xf32>
    %cst_57 = arith.constant 0.353553385 : f32
    %44 = vector.broadcast %cst_57 : f32 to vector<16x8xf32>
    %45 = arith.mulf %43, %44 : vector<16x8xf32>
    %cst_58 = arith.constant 0.000000e+00 : f32
    %46 = vector.broadcast %cst_58 : f32 to vector<1x8xf32>
    %47 = arith.cmpf ogt, %7, %46 : vector<1x8xf32>
    %cst_59 = arith.constant -1.000000e+09 : f32
    %48 = vector.shape_cast %47 : vector<1x8xi1> to vector<1x8xi1>
    %49 = vector.broadcast %48 : vector<1x8xi1> to vector<16x8xi1>
    %50 = vector.broadcast %cst_59 : f32 to vector<16x8xf32>
    %51 = arith.select %49, %45, %50 : vector<16x8xi1>, vector<16x8xf32>
    %cst_60 = arith.constant dense<0xFF800000> : vector<16xf32>
    %52 = vector.multi_reduction <maximumf>, %51, %cst_60 [1] : vector<16x8xf32> to vector<16xf32>
    %53 = vector.shape_cast %52 : vector<16xf32> to vector<16x1xf32>
    %54 = vector.broadcast %53 : vector<16x1xf32> to vector<16x8xf32>
    %55 = arith.subf %51, %54 : vector<16x8xf32>
    %56 = math.exp %55 : vector<16x8xf32>
    %cst_61 = arith.constant dense<0.000000e+00> : vector<16xf32>
    %57 = vector.multi_reduction <add>, %56, %cst_61 [1] : vector<16x8xf32> to vector<16xf32>
    %58 = vector.shape_cast %57 : vector<16xf32> to vector<16x1xf32>
    %59 = tpu.reciprocal %58 {approx = true} : vector<16x1xf32> -> vector<16x1xf32>
    %60 = vector.broadcast %59 : vector<16x1xf32> to vector<16x8xf32>
    %61 = arith.mulf %56, %60 : vector<16x8xf32>
    %cst_62 = arith.constant dense<0.000000e+00> : vector<16x8xf32>
    %62 = tpu.matmul %61, %30, %cst_62 {dimension_numbers = #tpu.dot_dimension_numbers<[1], [0], [0], [1], [0, 0, 1, 1], [], []>} : vector<16x8xf32>, vector<8x8xf32>, vector<16x8xf32> -> vector<16x8xf32>
    %c0_63 = arith.constant 0 : index
    %c0_64 = arith.constant 0 : index
    %c0_65 = arith.constant 0 : index
    %63 = vector.load %arg11[%c0_63, %c0_64, %c0_65] : memref<4x8x32xf32, #tpu.memory_space<vmem>>, vector<1x8x32xf32>
    %64 = vector.shape_cast %63 : vector<1x8x32xf32> to vector<8x32xf32>
    %cst_66 = arith.constant dense<0.000000e+00> : vector<16x32xf32>
    %65 = tpu.matmul %62, %64, %cst_66 {dimension_numbers = #tpu.dot_dimension_numbers<[1], [0], [0], [1], [0, 0, 1, 1], [], []>} : vector<16x8xf32>, vector<8x32xf32>, vector<16x32xf32> -> vector<16x32xf32>
    %c1_67 = arith.constant 1 : index
    %c0_68 = arith.constant 0 : index
    %c0_69 = arith.constant 0 : index
    %66 = vector.load %arg8[%c1_67, %c0_68, %c0_69] : memref<4x32x8xf32, #tpu.memory_space<vmem>>, vector<1x32x8xf32>
    %67 = vector.shape_cast %66 : vector<1x32x8xf32> to vector<32x8xf32>
    %cst_70 = arith.constant dense<0.000000e+00> : vector<16x8xf32>
    %68 = tpu.matmul %3, %67, %cst_70 {dimension_numbers = #tpu.dot_dimension_numbers<[1], [0], [0], [1], [0, 0, 1, 1], [], []>} : vector<16x32xf32>, vector<32x8xf32>, vector<16x8xf32> -> vector<16x8xf32>
    %cst_71 = arith.constant dense<0.000000e+00> : vector<16x8xf32>
    %69 = tpu.matmul %68, %21, %cst_71 {dimension_numbers = #tpu.dot_dimension_numbers<[1], [1], [0], [0], [0, 0, 1, 0], [], []>} : vector<16x8xf32>, vector<8x8xf32>, vector<16x8xf32> -> vector<16x8xf32>
    %cst_72 = arith.constant 0.353553385 : f32
    %70 = vector.broadcast %cst_72 : f32 to vector<16x8xf32>
    %71 = arith.mulf %69, %70 : vector<16x8xf32>
    %cst_73 = arith.constant 0.000000e+00 : f32
    %72 = vector.broadcast %cst_73 : f32 to vector<1x8xf32>
    %73 = arith.cmpf ogt, %7, %72 : vector<1x8xf32>
    %cst_74 = arith.constant -1.000000e+09 : f32
    %74 = vector.shape_cast %73 : vector<1x8xi1> to vector<1x8xi1>
    %75 = vector.broadcast %74 : vector<1x8xi1> to vector<16x8xi1>
    %76 = vector.broadcast %cst_74 : f32 to vector<16x8xf32>
    %77 = arith.select %75, %71, %76 : vector<16x8xi1>, vector<16x8xf32>
    %cst_75 = arith.constant dense<0xFF800000> : vector<16xf32>
    %78 = vector.multi_reduction <maximumf>, %77, %cst_75 [1] : vector<16x8xf32> to vector<16xf32>
    %79 = vector.shape_cast %78 : vector<16xf32> to vector<16x1xf32>
    %80 = vector.broadcast %79 : vector<16x1xf32> to vector<16x8xf32>
    %81 = arith.subf %77, %80 : vector<16x8xf32>
    %82 = math.exp %81 : vector<16x8xf32>
    %cst_76 = arith.constant dense<0.000000e+00> : vector<16xf32>
    %83 = vector.multi_reduction <add>, %82, %cst_76 [1] : vector<16x8xf32> to vector<16xf32>
    %84 = vector.shape_cast %83 : vector<16xf32> to vector<16x1xf32>
    %85 = tpu.reciprocal %84 {approx = true} : vector<16x1xf32> -> vector<16x1xf32>
    %86 = vector.broadcast %85 : vector<16x1xf32> to vector<16x8xf32>
    %87 = arith.mulf %82, %86 : vector<16x8xf32>
    %cst_77 = arith.constant dense<0.000000e+00> : vector<16x8xf32>
    %88 = tpu.matmul %87, %33, %cst_77 {dimension_numbers = #tpu.dot_dimension_numbers<[1], [0], [0], [1], [0, 0, 1, 1], [], []>} : vector<16x8xf32>, vector<8x8xf32>, vector<16x8xf32> -> vector<16x8xf32>
    %c1_78 = arith.constant 1 : index
    %c0_79 = arith.constant 0 : index
    %c0_80 = arith.constant 0 : index
    %89 = vector.load %arg11[%c1_78, %c0_79, %c0_80] : memref<4x8x32xf32, #tpu.memory_space<vmem>>, vector<1x8x32xf32>
    %90 = vector.shape_cast %89 : vector<1x8x32xf32> to vector<8x32xf32>
    %cst_81 = arith.constant dense<0.000000e+00> : vector<16x32xf32>
    %91 = tpu.matmul %88, %90, %cst_81 {dimension_numbers = #tpu.dot_dimension_numbers<[1], [0], [0], [1], [0, 0, 1, 1], [], []>} : vector<16x8xf32>, vector<8x32xf32>, vector<16x32xf32> -> vector<16x32xf32>
    %92 = arith.addf %65, %91 : vector<16x32xf32>
    %c2_82 = arith.constant 2 : index
    %c0_83 = arith.constant 0 : index
    %c0_84 = arith.constant 0 : index
    %93 = vector.load %arg8[%c2_82, %c0_83, %c0_84] : memref<4x32x8xf32, #tpu.memory_space<vmem>>, vector<1x32x8xf32>
    %94 = vector.shape_cast %93 : vector<1x32x8xf32> to vector<32x8xf32>
    %cst_85 = arith.constant dense<0.000000e+00> : vector<16x8xf32>
    %95 = tpu.matmul %3, %94, %cst_85 {dimension_numbers = #tpu.dot_dimension_numbers<[1], [0], [0], [1], [0, 0, 1, 1], [], []>} : vector<16x32xf32>, vector<32x8xf32>, vector<16x8xf32> -> vector<16x8xf32>
    %cst_86 = arith.constant dense<0.000000e+00> : vector<16x8xf32>
    %96 = tpu.matmul %95, %24, %cst_86 {dimension_numbers = #tpu.dot_dimension_numbers<[1], [1], [0], [0], [0, 0, 1, 0], [], []>} : vector<16x8xf32>, vector<8x8xf32>, vector<16x8xf32> -> vector<16x8xf32>
    %cst_87 = arith.constant 0.353553385 : f32
    %97 = vector.broadcast %cst_87 : f32 to vector<16x8xf32>
    %98 = arith.mulf %96, %97 : vector<16x8xf32>
    %cst_88 = arith.constant 0.000000e+00 : f32
    %99 = vector.broadcast %cst_88 : f32 to vector<1x8xf32>
    %100 = arith.cmpf ogt, %7, %99 : vector<1x8xf32>
    %cst_89 = arith.constant -1.000000e+09 : f32
    %101 = vector.shape_cast %100 : vector<1x8xi1> to vector<1x8xi1>
    %102 = vector.broadcast %101 : vector<1x8xi1> to vector<16x8xi1>
    %103 = vector.broadcast %cst_89 : f32 to vector<16x8xf32>
    %104 = arith.select %102, %98, %103 : vector<16x8xi1>, vector<16x8xf32>
    %cst_90 = arith.constant dense<0xFF800000> : vector<16xf32>
    %105 = vector.multi_reduction <maximumf>, %104, %cst_90 [1] : vector<16x8xf32> to vector<16xf32>
    %106 = vector.shape_cast %105 : vector<16xf32> to vector<16x1xf32>
    %107 = vector.broadcast %106 : vector<16x1xf32> to vector<16x8xf32>
    %108 = arith.subf %104, %107 : vector<16x8xf32>
    %109 = math.exp %108 : vector<16x8xf32>
    %cst_91 = arith.constant dense<0.000000e+00> : vector<16xf32>
    %110 = vector.multi_reduction <add>, %109, %cst_91 [1] : vector<16x8xf32> to vector<16xf32>
    %111 = vector.shape_cast %110 : vector<16xf32> to vector<16x1xf32>
    %112 = tpu.reciprocal %111 {approx = true} : vector<16x1xf32> -> vector<16x1xf32>
    %113 = vector.broadcast %112 : vector<16x1xf32> to vector<16x8xf32>
    %114 = arith.mulf %109, %113 : vector<16x8xf32>
    %cst_92 = arith.constant dense<0.000000e+00> : vector<16x8xf32>
    %115 = tpu.matmul %114, %36, %cst_92 {dimension_numbers = #tpu.dot_dimension_numbers<[1], [0], [0], [1], [0, 0, 1, 1], [], []>} : vector<16x8xf32>, vector<8x8xf32>, vector<16x8xf32> -> vector<16x8xf32>
    %c2_93 = arith.constant 2 : index
    %c0_94 = arith.constant 0 : index
    %c0_95 = arith.constant 0 : index
    %116 = vector.load %arg11[%c2_93, %c0_94, %c0_95] : memref<4x8x32xf32, #tpu.memory_space<vmem>>, vector<1x8x32xf32>
    %117 = vector.shape_cast %116 : vector<1x8x32xf32> to vector<8x32xf32>
    %cst_96 = arith.constant dense<0.000000e+00> : vector<16x32xf32>
    %118 = tpu.matmul %115, %117, %cst_96 {dimension_numbers = #tpu.dot_dimension_numbers<[1], [0], [0], [1], [0, 0, 1, 1], [], []>} : vector<16x8xf32>, vector<8x32xf32>, vector<16x32xf32> -> vector<16x32xf32>
    %119 = arith.addf %92, %118 : vector<16x32xf32>
    %c3_97 = arith.constant 3 : index
    %c0_98 = arith.constant 0 : index
    %c0_99 = arith.constant 0 : index
    %120 = vector.load %arg8[%c3_97, %c0_98, %c0_99] : memref<4x32x8xf32, #tpu.memory_space<vmem>>, vector<1x32x8xf32>
    %121 = vector.shape_cast %120 : vector<1x32x8xf32> to vector<32x8xf32>
    %cst_100 = arith.constant dense<0.000000e+00> : vector<16x8xf32>
    %122 = tpu.matmul %3, %121, %cst_100 {dimension_numbers = #tpu.dot_dimension_numbers<[1], [0], [0], [1], [0, 0, 1, 1], [], []>} : vector<16x32xf32>, vector<32x8xf32>, vector<16x8xf32> -> vector<16x8xf32>
    %cst_101 = arith.constant dense<0.000000e+00> : vector<16x8xf32>
    %123 = tpu.matmul %122, %27, %cst_101 {dimension_numbers = #tpu.dot_dimension_numbers<[1], [1], [0], [0], [0, 0, 1, 0], [], []>} : vector<16x8xf32>, vector<8x8xf32>, vector<16x8xf32> -> vector<16x8xf32>
    %cst_102 = arith.constant 0.353553385 : f32
    %124 = vector.broadcast %cst_102 : f32 to vector<16x8xf32>
    %125 = arith.mulf %123, %124 : vector<16x8xf32>
    %cst_103 = arith.constant 0.000000e+00 : f32
    %126 = vector.broadcast %cst_103 : f32 to vector<1x8xf32>
    %127 = arith.cmpf ogt, %7, %126 : vector<1x8xf32>
    %cst_104 = arith.constant -1.000000e+09 : f32
    %128 = vector.shape_cast %127 : vector<1x8xi1> to vector<1x8xi1>
    %129 = vector.broadcast %128 : vector<1x8xi1> to vector<16x8xi1>
    %130 = vector.broadcast %cst_104 : f32 to vector<16x8xf32>
    %131 = arith.select %129, %125, %130 : vector<16x8xi1>, vector<16x8xf32>
    %cst_105 = arith.constant dense<0xFF800000> : vector<16xf32>
    %132 = vector.multi_reduction <maximumf>, %131, %cst_105 [1] : vector<16x8xf32> to vector<16xf32>
    %133 = vector.shape_cast %132 : vector<16xf32> to vector<16x1xf32>
    %134 = vector.broadcast %133 : vector<16x1xf32> to vector<16x8xf32>
    %135 = arith.subf %131, %134 : vector<16x8xf32>
    %136 = math.exp %135 : vector<16x8xf32>
    %cst_106 = arith.constant dense<0.000000e+00> : vector<16xf32>
    %137 = vector.multi_reduction <add>, %136, %cst_106 [1] : vector<16x8xf32> to vector<16xf32>
    %138 = vector.shape_cast %137 : vector<16xf32> to vector<16x1xf32>
    %139 = tpu.reciprocal %138 {approx = true} : vector<16x1xf32> -> vector<16x1xf32>
    %140 = vector.broadcast %139 : vector<16x1xf32> to vector<16x8xf32>
    %141 = arith.mulf %136, %140 : vector<16x8xf32>
    %cst_107 = arith.constant dense<0.000000e+00> : vector<16x8xf32>
    %142 = tpu.matmul %141, %39, %cst_107 {dimension_numbers = #tpu.dot_dimension_numbers<[1], [0], [0], [1], [0, 0, 1, 1], [], []>} : vector<16x8xf32>, vector<8x8xf32>, vector<16x8xf32> -> vector<16x8xf32>
    %c3_108 = arith.constant 3 : index
    %c0_109 = arith.constant 0 : index
    %c0_110 = arith.constant 0 : index
    %143 = vector.load %arg11[%c3_108, %c0_109, %c0_110] : memref<4x8x32xf32, #tpu.memory_space<vmem>>, vector<1x8x32xf32>
    %144 = vector.shape_cast %143 : vector<1x8x32xf32> to vector<8x32xf32>
    %cst_111 = arith.constant dense<0.000000e+00> : vector<16x32xf32>
    %145 = tpu.matmul %142, %144, %cst_111 {dimension_numbers = #tpu.dot_dimension_numbers<[1], [0], [0], [1], [0, 0, 1, 1], [], []>} : vector<16x8xf32>, vector<8x32xf32>, vector<16x32xf32> -> vector<16x32xf32>
    %146 = arith.addf %119, %145 : vector<16x32xf32>
    %147 = vector.broadcast %11 : vector<16x1xf32> to vector<16x32xf32>
    %148 = arith.mulf %146, %147 : vector<16x32xf32>
    %c0_112 = arith.constant 0 : index
    %c0_113 = arith.constant 0 : index
    %c0_114 = arith.constant 0 : index
    %149 = vector.load %arg8[%c0_112, %c0_113, %c0_114] : memref<4x32x8xf32, #tpu.memory_space<vmem>>, vector<1x32x8xf32>
    %150 = vector.shape_cast %149 : vector<1x32x8xf32> to vector<32x8xf32>
    %cst_115 = arith.constant dense<0.000000e+00> : vector<16x8xf32>
    %151 = tpu.matmul %5, %150, %cst_115 {dimension_numbers = #tpu.dot_dimension_numbers<[1], [0], [0], [1], [0, 0, 1, 1], [], []>} : vector<16x32xf32>, vector<32x8xf32>, vector<16x8xf32> -> vector<16x8xf32>
    %cst_116 = arith.constant dense<0.000000e+00> : vector<16x8xf32>
    %152 = tpu.matmul %151, %18, %cst_116 {dimension_numbers = #tpu.dot_dimension_numbers<[1], [1], [0], [0], [0, 0, 1, 0], [], []>} : vector<16x8xf32>, vector<8x8xf32>, vector<16x8xf32> -> vector<16x8xf32>
    %cst_117 = arith.constant 0.353553385 : f32
    %153 = vector.broadcast %cst_117 : f32 to vector<16x8xf32>
    %154 = arith.mulf %152, %153 : vector<16x8xf32>
    %cst_118 = arith.constant 0.000000e+00 : f32
    %155 = vector.broadcast %cst_118 : f32 to vector<1x8xf32>
    %156 = arith.cmpf ogt, %7, %155 : vector<1x8xf32>
    %cst_119 = arith.constant -1.000000e+09 : f32
    %157 = vector.shape_cast %156 : vector<1x8xi1> to vector<1x8xi1>
    %158 = vector.broadcast %157 : vector<1x8xi1> to vector<16x8xi1>
    %159 = vector.broadcast %cst_119 : f32 to vector<16x8xf32>
    %160 = arith.select %158, %154, %159 : vector<16x8xi1>, vector<16x8xf32>
    %cst_120 = arith.constant dense<0xFF800000> : vector<16xf32>
    %161 = vector.multi_reduction <maximumf>, %160, %cst_120 [1] : vector<16x8xf32> to vector<16xf32>
    %162 = vector.shape_cast %161 : vector<16xf32> to vector<16x1xf32>
    %163 = vector.broadcast %162 : vector<16x1xf32> to vector<16x8xf32>
    %164 = arith.subf %160, %163 : vector<16x8xf32>
    %165 = math.exp %164 : vector<16x8xf32>
    %cst_121 = arith.constant dense<0.000000e+00> : vector<16xf32>
    %166 = vector.multi_reduction <add>, %165, %cst_121 [1] : vector<16x8xf32> to vector<16xf32>
    %167 = vector.shape_cast %166 : vector<16xf32> to vector<16x1xf32>
    %168 = tpu.reciprocal %167 {approx = true} : vector<16x1xf32> -> vector<16x1xf32>
    %169 = vector.broadcast %168 : vector<16x1xf32> to vector<16x8xf32>
    %170 = arith.mulf %165, %169 : vector<16x8xf32>
    %cst_122 = arith.constant dense<0.000000e+00> : vector<16x8xf32>
    %171 = tpu.matmul %170, %30, %cst_122 {dimension_numbers = #tpu.dot_dimension_numbers<[1], [0], [0], [1], [0, 0, 1, 1], [], []>} : vector<16x8xf32>, vector<8x8xf32>, vector<16x8xf32> -> vector<16x8xf32>
    %c0_123 = arith.constant 0 : index
    %c0_124 = arith.constant 0 : index
    %c0_125 = arith.constant 0 : index
    %172 = vector.load %arg11[%c0_123, %c0_124, %c0_125] : memref<4x8x32xf32, #tpu.memory_space<vmem>>, vector<1x8x32xf32>
    %173 = vector.shape_cast %172 : vector<1x8x32xf32> to vector<8x32xf32>
    %cst_126 = arith.constant dense<0.000000e+00> : vector<16x32xf32>
    %174 = tpu.matmul %171, %173, %cst_126 {dimension_numbers = #tpu.dot_dimension_numbers<[1], [0], [0], [1], [0, 0, 1, 1], [], []>} : vector<16x8xf32>, vector<8x32xf32>, vector<16x32xf32> -> vector<16x32xf32>
    %c1_127 = arith.constant 1 : index
    %c0_128 = arith.constant 0 : index
    %c0_129 = arith.constant 0 : index
    %175 = vector.load %arg8[%c1_127, %c0_128, %c0_129] : memref<4x32x8xf32, #tpu.memory_space<vmem>>, vector<1x32x8xf32>
    %176 = vector.shape_cast %175 : vector<1x32x8xf32> to vector<32x8xf32>
    %cst_130 = arith.constant dense<0.000000e+00> : vector<16x8xf32>
    %177 = tpu.matmul %5, %176, %cst_130 {dimension_numbers = #tpu.dot_dimension_numbers<[1], [0], [0], [1], [0, 0, 1, 1], [], []>} : vector<16x32xf32>, vector<32x8xf32>, vector<16x8xf32> -> vector<16x8xf32>
    %cst_131 = arith.constant dense<0.000000e+00> : vector<16x8xf32>
    %178 = tpu.matmul %177, %21, %cst_131 {dimension_numbers = #tpu.dot_dimension_numbers<[1], [1], [0], [0], [0, 0, 1, 0], [], []>} : vector<16x8xf32>, vector<8x8xf32>, vector<16x8xf32> -> vector<16x8xf32>
    %cst_132 = arith.constant 0.353553385 : f32
    %179 = vector.broadcast %cst_132 : f32 to vector<16x8xf32>
    %180 = arith.mulf %178, %179 : vector<16x8xf32>
    %cst_133 = arith.constant 0.000000e+00 : f32
    %181 = vector.broadcast %cst_133 : f32 to vector<1x8xf32>
    %182 = arith.cmpf ogt, %7, %181 : vector<1x8xf32>
    %cst_134 = arith.constant -1.000000e+09 : f32
    %183 = vector.shape_cast %182 : vector<1x8xi1> to vector<1x8xi1>
    %184 = vector.broadcast %183 : vector<1x8xi1> to vector<16x8xi1>
    %185 = vector.broadcast %cst_134 : f32 to vector<16x8xf32>
    %186 = arith.select %184, %180, %185 : vector<16x8xi1>, vector<16x8xf32>
    %cst_135 = arith.constant dense<0xFF800000> : vector<16xf32>
    %187 = vector.multi_reduction <maximumf>, %186, %cst_135 [1] : vector<16x8xf32> to vector<16xf32>
    %188 = vector.shape_cast %187 : vector<16xf32> to vector<16x1xf32>
    %189 = vector.broadcast %188 : vector<16x1xf32> to vector<16x8xf32>
    %190 = arith.subf %186, %189 : vector<16x8xf32>
    %191 = math.exp %190 : vector<16x8xf32>
    %cst_136 = arith.constant dense<0.000000e+00> : vector<16xf32>
    %192 = vector.multi_reduction <add>, %191, %cst_136 [1] : vector<16x8xf32> to vector<16xf32>
    %193 = vector.shape_cast %192 : vector<16xf32> to vector<16x1xf32>
    %194 = tpu.reciprocal %193 {approx = true} : vector<16x1xf32> -> vector<16x1xf32>
    %195 = vector.broadcast %194 : vector<16x1xf32> to vector<16x8xf32>
    %196 = arith.mulf %191, %195 : vector<16x8xf32>
    %cst_137 = arith.constant dense<0.000000e+00> : vector<16x8xf32>
    %197 = tpu.matmul %196, %33, %cst_137 {dimension_numbers = #tpu.dot_dimension_numbers<[1], [0], [0], [1], [0, 0, 1, 1], [], []>} : vector<16x8xf32>, vector<8x8xf32>, vector<16x8xf32> -> vector<16x8xf32>
    %c1_138 = arith.constant 1 : index
    %c0_139 = arith.constant 0 : index
    %c0_140 = arith.constant 0 : index
    %198 = vector.load %arg11[%c1_138, %c0_139, %c0_140] : memref<4x8x32xf32, #tpu.memory_space<vmem>>, vector<1x8x32xf32>
    %199 = vector.shape_cast %198 : vector<1x8x32xf32> to vector<8x32xf32>
    %cst_141 = arith.constant dense<0.000000e+00> : vector<16x32xf32>
    %200 = tpu.matmul %197, %199, %cst_141 {dimension_numbers = #tpu.dot_dimension_numbers<[1], [0], [0], [1], [0, 0, 1, 1], [], []>} : vector<16x8xf32>, vector<8x32xf32>, vector<16x32xf32> -> vector<16x32xf32>
    %201 = arith.addf %174, %200 : vector<16x32xf32>
    %c2_142 = arith.constant 2 : index
    %c0_143 = arith.constant 0 : index
    %c0_144 = arith.constant 0 : index
    %202 = vector.load %arg8[%c2_142, %c0_143, %c0_144] : memref<4x32x8xf32, #tpu.memory_space<vmem>>, vector<1x32x8xf32>
    %203 = vector.shape_cast %202 : vector<1x32x8xf32> to vector<32x8xf32>
    %cst_145 = arith.constant dense<0.000000e+00> : vector<16x8xf32>
    %204 = tpu.matmul %5, %203, %cst_145 {dimension_numbers = #tpu.dot_dimension_numbers<[1], [0], [0], [1], [0, 0, 1, 1], [], []>} : vector<16x32xf32>, vector<32x8xf32>, vector<16x8xf32> -> vector<16x8xf32>
    %cst_146 = arith.constant dense<0.000000e+00> : vector<16x8xf32>
    %205 = tpu.matmul %204, %24, %cst_146 {dimension_numbers = #tpu.dot_dimension_numbers<[1], [1], [0], [0], [0, 0, 1, 0], [], []>} : vector<16x8xf32>, vector<8x8xf32>, vector<16x8xf32> -> vector<16x8xf32>
    %cst_147 = arith.constant 0.353553385 : f32
    %206 = vector.broadcast %cst_147 : f32 to vector<16x8xf32>
    %207 = arith.mulf %205, %206 : vector<16x8xf32>
    %cst_148 = arith.constant 0.000000e+00 : f32
    %208 = vector.broadcast %cst_148 : f32 to vector<1x8xf32>
    %209 = arith.cmpf ogt, %7, %208 : vector<1x8xf32>
    %cst_149 = arith.constant -1.000000e+09 : f32
    %210 = vector.shape_cast %209 : vector<1x8xi1> to vector<1x8xi1>
    %211 = vector.broadcast %210 : vector<1x8xi1> to vector<16x8xi1>
    %212 = vector.broadcast %cst_149 : f32 to vector<16x8xf32>
    %213 = arith.select %211, %207, %212 : vector<16x8xi1>, vector<16x8xf32>
    %cst_150 = arith.constant dense<0xFF800000> : vector<16xf32>
    %214 = vector.multi_reduction <maximumf>, %213, %cst_150 [1] : vector<16x8xf32> to vector<16xf32>
    %215 = vector.shape_cast %214 : vector<16xf32> to vector<16x1xf32>
    %216 = vector.broadcast %215 : vector<16x1xf32> to vector<16x8xf32>
    %217 = arith.subf %213, %216 : vector<16x8xf32>
    %218 = math.exp %217 : vector<16x8xf32>
    %cst_151 = arith.constant dense<0.000000e+00> : vector<16xf32>
    %219 = vector.multi_reduction <add>, %218, %cst_151 [1] : vector<16x8xf32> to vector<16xf32>
    %220 = vector.shape_cast %219 : vector<16xf32> to vector<16x1xf32>
    %221 = tpu.reciprocal %220 {approx = true} : vector<16x1xf32> -> vector<16x1xf32>
    %222 = vector.broadcast %221 : vector<16x1xf32> to vector<16x8xf32>
    %223 = arith.mulf %218, %222 : vector<16x8xf32>
    %cst_152 = arith.constant dense<0.000000e+00> : vector<16x8xf32>
    %224 = tpu.matmul %223, %36, %cst_152 {dimension_numbers = #tpu.dot_dimension_numbers<[1], [0], [0], [1], [0, 0, 1, 1], [], []>} : vector<16x8xf32>, vector<8x8xf32>, vector<16x8xf32> -> vector<16x8xf32>
    %c2_153 = arith.constant 2 : index
    %c0_154 = arith.constant 0 : index
    %c0_155 = arith.constant 0 : index
    %225 = vector.load %arg11[%c2_153, %c0_154, %c0_155] : memref<4x8x32xf32, #tpu.memory_space<vmem>>, vector<1x8x32xf32>
    %226 = vector.shape_cast %225 : vector<1x8x32xf32> to vector<8x32xf32>
    %cst_156 = arith.constant dense<0.000000e+00> : vector<16x32xf32>
    %227 = tpu.matmul %224, %226, %cst_156 {dimension_numbers = #tpu.dot_dimension_numbers<[1], [0], [0], [1], [0, 0, 1, 1], [], []>} : vector<16x8xf32>, vector<8x32xf32>, vector<16x32xf32> -> vector<16x32xf32>
    %228 = arith.addf %201, %227 : vector<16x32xf32>
    %c3_157 = arith.constant 3 : index
    %c0_158 = arith.constant 0 : index
    %c0_159 = arith.constant 0 : index
    %229 = vector.load %arg8[%c3_157, %c0_158, %c0_159] : memref<4x32x8xf32, #tpu.memory_space<vmem>>, vector<1x32x8xf32>
    %230 = vector.shape_cast %229 : vector<1x32x8xf32> to vector<32x8xf32>
    %cst_160 = arith.constant dense<0.000000e+00> : vector<16x8xf32>
    %231 = tpu.matmul %5, %230, %cst_160 {dimension_numbers = #tpu.dot_dimension_numbers<[1], [0], [0], [1], [0, 0, 1, 1], [], []>} : vector<16x32xf32>, vector<32x8xf32>, vector<16x8xf32> -> vector<16x8xf32>
    %cst_161 = arith.constant dense<0.000000e+00> : vector<16x8xf32>
    %232 = tpu.matmul %231, %27, %cst_161 {dimension_numbers = #tpu.dot_dimension_numbers<[1], [1], [0], [0], [0, 0, 1, 0], [], []>} : vector<16x8xf32>, vector<8x8xf32>, vector<16x8xf32> -> vector<16x8xf32>
    %cst_162 = arith.constant 0.353553385 : f32
    %233 = vector.broadcast %cst_162 : f32 to vector<16x8xf32>
    %234 = arith.mulf %232, %233 : vector<16x8xf32>
    %cst_163 = arith.constant 0.000000e+00 : f32
    %235 = vector.broadcast %cst_163 : f32 to vector<1x8xf32>
    %236 = arith.cmpf ogt, %7, %235 : vector<1x8xf32>
    %cst_164 = arith.constant -1.000000e+09 : f32
    %237 = vector.shape_cast %236 : vector<1x8xi1> to vector<1x8xi1>
    %238 = vector.broadcast %237 : vector<1x8xi1> to vector<16x8xi1>
    %239 = vector.broadcast %cst_164 : f32 to vector<16x8xf32>
    %240 = arith.select %238, %234, %239 : vector<16x8xi1>, vector<16x8xf32>
    %cst_165 = arith.constant dense<0xFF800000> : vector<16xf32>
    %241 = vector.multi_reduction <maximumf>, %240, %cst_165 [1] : vector<16x8xf32> to vector<16xf32>
    %242 = vector.shape_cast %241 : vector<16xf32> to vector<16x1xf32>
    %243 = vector.broadcast %242 : vector<16x1xf32> to vector<16x8xf32>
    %244 = arith.subf %240, %243 : vector<16x8xf32>
    %245 = math.exp %244 : vector<16x8xf32>
    %cst_166 = arith.constant dense<0.000000e+00> : vector<16xf32>
    %246 = vector.multi_reduction <add>, %245, %cst_166 [1] : vector<16x8xf32> to vector<16xf32>
    %247 = vector.shape_cast %246 : vector<16xf32> to vector<16x1xf32>
    %248 = tpu.reciprocal %247 {approx = true} : vector<16x1xf32> -> vector<16x1xf32>
    %249 = vector.broadcast %248 : vector<16x1xf32> to vector<16x8xf32>
    %250 = arith.mulf %245, %249 : vector<16x8xf32>
    %cst_167 = arith.constant dense<0.000000e+00> : vector<16x8xf32>
    %251 = tpu.matmul %250, %39, %cst_167 {dimension_numbers = #tpu.dot_dimension_numbers<[1], [0], [0], [1], [0, 0, 1, 1], [], []>} : vector<16x8xf32>, vector<8x8xf32>, vector<16x8xf32> -> vector<16x8xf32>
    %c3_168 = arith.constant 3 : index
    %c0_169 = arith.constant 0 : index
    %c0_170 = arith.constant 0 : index
    %252 = vector.load %arg11[%c3_168, %c0_169, %c0_170] : memref<4x8x32xf32, #tpu.memory_space<vmem>>, vector<1x8x32xf32>
    %253 = vector.shape_cast %252 : vector<1x8x32xf32> to vector<8x32xf32>
    %cst_171 = arith.constant dense<0.000000e+00> : vector<16x32xf32>
    %254 = tpu.matmul %251, %253, %cst_171 {dimension_numbers = #tpu.dot_dimension_numbers<[1], [0], [0], [1], [0, 0, 1, 1], [], []>} : vector<16x8xf32>, vector<8x32xf32>, vector<16x32xf32> -> vector<16x32xf32>
    %255 = arith.addf %228, %254 : vector<16x32xf32>
    %256 = vector.broadcast %13 : vector<16x1xf32> to vector<16x32xf32>
    %257 = arith.mulf %255, %256 : vector<16x32xf32>
    %c0_172 = arith.constant 0 : index
    %c0_173 = arith.constant 0 : index
    %c0_174 = arith.constant 0 : index
    %258 = vector.load %arg8[%c0_172, %c0_173, %c0_174] : memref<4x32x8xf32, #tpu.memory_space<vmem>>, vector<1x32x8xf32>
    %259 = vector.shape_cast %258 : vector<1x32x8xf32> to vector<32x8xf32>
    %cst_175 = arith.constant dense<0.000000e+00> : vector<8x8xf32>
    %260 = tpu.matmul %1, %259, %cst_175 {dimension_numbers = #tpu.dot_dimension_numbers<[1], [0], [0], [1], [0, 0, 1, 1], [], []>} : vector<8x32xf32>, vector<32x8xf32>, vector<8x8xf32> -> vector<8x8xf32>
    %cst_176 = arith.constant dense<0.000000e+00> : vector<8x8xf32>
    %261 = tpu.matmul %260, %18, %cst_176 {dimension_numbers = #tpu.dot_dimension_numbers<[1], [1], [0], [0], [0, 0, 1, 0], [], []>} : vector<8x8xf32>, vector<8x8xf32>, vector<8x8xf32> -> vector<8x8xf32>
    %cst_177 = arith.constant 0.353553385 : f32
    %262 = vector.broadcast %cst_177 : f32 to vector<8x8xf32>
    %263 = arith.mulf %261, %262 : vector<8x8xf32>
    %cst_178 = arith.constant 0.000000e+00 : f32
    %264 = vector.broadcast %cst_178 : f32 to vector<1x8xf32>
    %265 = arith.cmpf ogt, %7, %264 : vector<1x8xf32>
    %cst_179 = arith.constant -1.000000e+09 : f32
    %266 = vector.shape_cast %265 : vector<1x8xi1> to vector<1x8xi1>
    %267 = vector.broadcast %266 : vector<1x8xi1> to vector<8x8xi1>
    %268 = vector.broadcast %cst_179 : f32 to vector<8x8xf32>
    %269 = arith.select %267, %263, %268 : vector<8x8xi1>, vector<8x8xf32>
    %cst_180 = arith.constant dense<0xFF800000> : vector<8xf32>
    %270 = vector.multi_reduction <maximumf>, %269, %cst_180 [1] : vector<8x8xf32> to vector<8xf32>
    %271 = vector.shape_cast %270 : vector<8xf32> to vector<8x1xf32>
    %272 = vector.broadcast %271 : vector<8x1xf32> to vector<8x8xf32>
    %273 = arith.subf %269, %272 : vector<8x8xf32>
    %274 = math.exp %273 : vector<8x8xf32>
    %cst_181 = arith.constant dense<0.000000e+00> : vector<8xf32>
    %275 = vector.multi_reduction <add>, %274, %cst_181 [1] : vector<8x8xf32> to vector<8xf32>
    %276 = vector.shape_cast %275 : vector<8xf32> to vector<8x1xf32>
    %277 = tpu.reciprocal %276 {approx = true} : vector<8x1xf32> -> vector<8x1xf32>
    %278 = vector.broadcast %277 : vector<8x1xf32> to vector<8x8xf32>
    %279 = arith.mulf %274, %278 : vector<8x8xf32>
    %cst_182 = arith.constant dense<0.000000e+00> : vector<8x8xf32>
    %280 = tpu.matmul %279, %30, %cst_182 {dimension_numbers = #tpu.dot_dimension_numbers<[1], [0], [0], [1], [0, 0, 1, 1], [], []>} : vector<8x8xf32>, vector<8x8xf32>, vector<8x8xf32> -> vector<8x8xf32>
    %c0_183 = arith.constant 0 : index
    %c0_184 = arith.constant 0 : index
    %c0_185 = arith.constant 0 : index
    %281 = vector.load %arg11[%c0_183, %c0_184, %c0_185] : memref<4x8x32xf32, #tpu.memory_space<vmem>>, vector<1x8x32xf32>
    %282 = vector.shape_cast %281 : vector<1x8x32xf32> to vector<8x32xf32>
    %cst_186 = arith.constant dense<0.000000e+00> : vector<8x32xf32>
    %283 = tpu.matmul %280, %282, %cst_186 {dimension_numbers = #tpu.dot_dimension_numbers<[1], [0], [0], [1], [0, 0, 1, 1], [], []>} : vector<8x8xf32>, vector<8x32xf32>, vector<8x32xf32> -> vector<8x32xf32>
    %c1_187 = arith.constant 1 : index
    %c0_188 = arith.constant 0 : index
    %c0_189 = arith.constant 0 : index
    %284 = vector.load %arg8[%c1_187, %c0_188, %c0_189] : memref<4x32x8xf32, #tpu.memory_space<vmem>>, vector<1x32x8xf32>
    %285 = vector.shape_cast %284 : vector<1x32x8xf32> to vector<32x8xf32>
    %cst_190 = arith.constant dense<0.000000e+00> : vector<8x8xf32>
    %286 = tpu.matmul %1, %285, %cst_190 {dimension_numbers = #tpu.dot_dimension_numbers<[1], [0], [0], [1], [0, 0, 1, 1], [], []>} : vector<8x32xf32>, vector<32x8xf32>, vector<8x8xf32> -> vector<8x8xf32>
    %cst_191 = arith.constant dense<0.000000e+00> : vector<8x8xf32>
    %287 = tpu.matmul %286, %21, %cst_191 {dimension_numbers = #tpu.dot_dimension_numbers<[1], [1], [0], [0], [0, 0, 1, 0], [], []>} : vector<8x8xf32>, vector<8x8xf32>, vector<8x8xf32> -> vector<8x8xf32>
    %cst_192 = arith.constant 0.353553385 : f32
    %288 = vector.broadcast %cst_192 : f32 to vector<8x8xf32>
    %289 = arith.mulf %287, %288 : vector<8x8xf32>
    %cst_193 = arith.constant 0.000000e+00 : f32
    %290 = vector.broadcast %cst_193 : f32 to vector<1x8xf32>
    %291 = arith.cmpf ogt, %7, %290 : vector<1x8xf32>
    %cst_194 = arith.constant -1.000000e+09 : f32
    %292 = vector.shape_cast %291 : vector<1x8xi1> to vector<1x8xi1>
    %293 = vector.broadcast %292 : vector<1x8xi1> to vector<8x8xi1>
    %294 = vector.broadcast %cst_194 : f32 to vector<8x8xf32>
    %295 = arith.select %293, %289, %294 : vector<8x8xi1>, vector<8x8xf32>
    %cst_195 = arith.constant dense<0xFF800000> : vector<8xf32>
    %296 = vector.multi_reduction <maximumf>, %295, %cst_195 [1] : vector<8x8xf32> to vector<8xf32>
    %297 = vector.shape_cast %296 : vector<8xf32> to vector<8x1xf32>
    %298 = vector.broadcast %297 : vector<8x1xf32> to vector<8x8xf32>
    %299 = arith.subf %295, %298 : vector<8x8xf32>
    %300 = math.exp %299 : vector<8x8xf32>
    %cst_196 = arith.constant dense<0.000000e+00> : vector<8xf32>
    %301 = vector.multi_reduction <add>, %300, %cst_196 [1] : vector<8x8xf32> to vector<8xf32>
    %302 = vector.shape_cast %301 : vector<8xf32> to vector<8x1xf32>
    %303 = tpu.reciprocal %302 {approx = true} : vector<8x1xf32> -> vector<8x1xf32>
    %304 = vector.broadcast %303 : vector<8x1xf32> to vector<8x8xf32>
    %305 = arith.mulf %300, %304 : vector<8x8xf32>
    %cst_197 = arith.constant dense<0.000000e+00> : vector<8x8xf32>
    %306 = tpu.matmul %305, %33, %cst_197 {dimension_numbers = #tpu.dot_dimension_numbers<[1], [0], [0], [1], [0, 0, 1, 1], [], []>} : vector<8x8xf32>, vector<8x8xf32>, vector<8x8xf32> -> vector<8x8xf32>
    %c1_198 = arith.constant 1 : index
    %c0_199 = arith.constant 0 : index
    %c0_200 = arith.constant 0 : index
    %307 = vector.load %arg11[%c1_198, %c0_199, %c0_200] : memref<4x8x32xf32, #tpu.memory_space<vmem>>, vector<1x8x32xf32>
    %308 = vector.shape_cast %307 : vector<1x8x32xf32> to vector<8x32xf32>
    %cst_201 = arith.constant dense<0.000000e+00> : vector<8x32xf32>
    %309 = tpu.matmul %306, %308, %cst_201 {dimension_numbers = #tpu.dot_dimension_numbers<[1], [0], [0], [1], [0, 0, 1, 1], [], []>} : vector<8x8xf32>, vector<8x32xf32>, vector<8x32xf32> -> vector<8x32xf32>
    %310 = arith.addf %283, %309 : vector<8x32xf32>
    %c2_202 = arith.constant 2 : index
    %c0_203 = arith.constant 0 : index
    %c0_204 = arith.constant 0 : index
    %311 = vector.load %arg8[%c2_202, %c0_203, %c0_204] : memref<4x32x8xf32, #tpu.memory_space<vmem>>, vector<1x32x8xf32>
    %312 = vector.shape_cast %311 : vector<1x32x8xf32> to vector<32x8xf32>
    %cst_205 = arith.constant dense<0.000000e+00> : vector<8x8xf32>
    %313 = tpu.matmul %1, %312, %cst_205 {dimension_numbers = #tpu.dot_dimension_numbers<[1], [0], [0], [1], [0, 0, 1, 1], [], []>} : vector<8x32xf32>, vector<32x8xf32>, vector<8x8xf32> -> vector<8x8xf32>
    %cst_206 = arith.constant dense<0.000000e+00> : vector<8x8xf32>
    %314 = tpu.matmul %313, %24, %cst_206 {dimension_numbers = #tpu.dot_dimension_numbers<[1], [1], [0], [0], [0, 0, 1, 0], [], []>} : vector<8x8xf32>, vector<8x8xf32>, vector<8x8xf32> -> vector<8x8xf32>
    %cst_207 = arith.constant 0.353553385 : f32
    %315 = vector.broadcast %cst_207 : f32 to vector<8x8xf32>
    %316 = arith.mulf %314, %315 : vector<8x8xf32>
    %cst_208 = arith.constant 0.000000e+00 : f32
    %317 = vector.broadcast %cst_208 : f32 to vector<1x8xf32>
    %318 = arith.cmpf ogt, %7, %317 : vector<1x8xf32>
    %cst_209 = arith.constant -1.000000e+09 : f32
    %319 = vector.shape_cast %318 : vector<1x8xi1> to vector<1x8xi1>
    %320 = vector.broadcast %319 : vector<1x8xi1> to vector<8x8xi1>
    %321 = vector.broadcast %cst_209 : f32 to vector<8x8xf32>
    %322 = arith.select %320, %316, %321 : vector<8x8xi1>, vector<8x8xf32>
    %cst_210 = arith.constant dense<0xFF800000> : vector<8xf32>
    %323 = vector.multi_reduction <maximumf>, %322, %cst_210 [1] : vector<8x8xf32> to vector<8xf32>
    %324 = vector.shape_cast %323 : vector<8xf32> to vector<8x1xf32>
    %325 = vector.broadcast %324 : vector<8x1xf32> to vector<8x8xf32>
    %326 = arith.subf %322, %325 : vector<8x8xf32>
    %327 = math.exp %326 : vector<8x8xf32>
    %cst_211 = arith.constant dense<0.000000e+00> : vector<8xf32>
    %328 = vector.multi_reduction <add>, %327, %cst_211 [1] : vector<8x8xf32> to vector<8xf32>
    %329 = vector.shape_cast %328 : vector<8xf32> to vector<8x1xf32>
    %330 = tpu.reciprocal %329 {approx = true} : vector<8x1xf32> -> vector<8x1xf32>
    %331 = vector.broadcast %330 : vector<8x1xf32> to vector<8x8xf32>
    %332 = arith.mulf %327, %331 : vector<8x8xf32>
    %cst_212 = arith.constant dense<0.000000e+00> : vector<8x8xf32>
    %333 = tpu.matmul %332, %36, %cst_212 {dimension_numbers = #tpu.dot_dimension_numbers<[1], [0], [0], [1], [0, 0, 1, 1], [], []>} : vector<8x8xf32>, vector<8x8xf32>, vector<8x8xf32> -> vector<8x8xf32>
    %c2_213 = arith.constant 2 : index
    %c0_214 = arith.constant 0 : index
    %c0_215 = arith.constant 0 : index
    %334 = vector.load %arg11[%c2_213, %c0_214, %c0_215] : memref<4x8x32xf32, #tpu.memory_space<vmem>>, vector<1x8x32xf32>
    %335 = vector.shape_cast %334 : vector<1x8x32xf32> to vector<8x32xf32>
    %cst_216 = arith.constant dense<0.000000e+00> : vector<8x32xf32>
    %336 = tpu.matmul %333, %335, %cst_216 {dimension_numbers = #tpu.dot_dimension_numbers<[1], [0], [0], [1], [0, 0, 1, 1], [], []>} : vector<8x8xf32>, vector<8x32xf32>, vector<8x32xf32> -> vector<8x32xf32>
    %337 = arith.addf %310, %336 : vector<8x32xf32>
    %c3_217 = arith.constant 3 : index
    %c0_218 = arith.constant 0 : index
    %c0_219 = arith.constant 0 : index
    %338 = vector.load %arg8[%c3_217, %c0_218, %c0_219] : memref<4x32x8xf32, #tpu.memory_space<vmem>>, vector<1x32x8xf32>
    %339 = vector.shape_cast %338 : vector<1x32x8xf32> to vector<32x8xf32>
    %cst_220 = arith.constant dense<0.000000e+00> : vector<8x8xf32>
    %340 = tpu.matmul %1, %339, %cst_220 {dimension_numbers = #tpu.dot_dimension_numbers<[1], [0], [0], [1], [0, 0, 1, 1], [], []>} : vector<8x32xf32>, vector<32x8xf32>, vector<8x8xf32> -> vector<8x8xf32>
    %cst_221 = arith.constant dense<0.000000e+00> : vector<8x8xf32>
    %341 = tpu.matmul %340, %27, %cst_221 {dimension_numbers = #tpu.dot_dimension_numbers<[1], [1], [0], [0], [0, 0, 1, 0], [], []>} : vector<8x8xf32>, vector<8x8xf32>, vector<8x8xf32> -> vector<8x8xf32>
    %cst_222 = arith.constant 0.353553385 : f32
    %342 = vector.broadcast %cst_222 : f32 to vector<8x8xf32>
    %343 = arith.mulf %341, %342 : vector<8x8xf32>
    %cst_223 = arith.constant 0.000000e+00 : f32
    %344 = vector.broadcast %cst_223 : f32 to vector<1x8xf32>
    %345 = arith.cmpf ogt, %7, %344 : vector<1x8xf32>
    %cst_224 = arith.constant -1.000000e+09 : f32
    %346 = vector.shape_cast %345 : vector<1x8xi1> to vector<1x8xi1>
    %347 = vector.broadcast %346 : vector<1x8xi1> to vector<8x8xi1>
    %348 = vector.broadcast %cst_224 : f32 to vector<8x8xf32>
    %349 = arith.select %347, %343, %348 : vector<8x8xi1>, vector<8x8xf32>
    %cst_225 = arith.constant dense<0xFF800000> : vector<8xf32>
    %350 = vector.multi_reduction <maximumf>, %349, %cst_225 [1] : vector<8x8xf32> to vector<8xf32>
    %351 = vector.shape_cast %350 : vector<8xf32> to vector<8x1xf32>
    %352 = vector.broadcast %351 : vector<8x1xf32> to vector<8x8xf32>
    %353 = arith.subf %349, %352 : vector<8x8xf32>
    %354 = math.exp %353 : vector<8x8xf32>
    %cst_226 = arith.constant dense<0.000000e+00> : vector<8xf32>
    %355 = vector.multi_reduction <add>, %354, %cst_226 [1] : vector<8x8xf32> to vector<8xf32>
    %356 = vector.shape_cast %355 : vector<8xf32> to vector<8x1xf32>
    %357 = tpu.reciprocal %356 {approx = true} : vector<8x1xf32> -> vector<8x1xf32>
    %358 = vector.broadcast %357 : vector<8x1xf32> to vector<8x8xf32>
    %359 = arith.mulf %354, %358 : vector<8x8xf32>
    %cst_227 = arith.constant dense<0.000000e+00> : vector<8x8xf32>
    %360 = tpu.matmul %359, %39, %cst_227 {dimension_numbers = #tpu.dot_dimension_numbers<[1], [0], [0], [1], [0, 0, 1, 1], [], []>} : vector<8x8xf32>, vector<8x8xf32>, vector<8x8xf32> -> vector<8x8xf32>
    %c3_228 = arith.constant 3 : index
    %c0_229 = arith.constant 0 : index
    %c0_230 = arith.constant 0 : index
    %361 = vector.load %arg11[%c3_228, %c0_229, %c0_230] : memref<4x8x32xf32, #tpu.memory_space<vmem>>, vector<1x8x32xf32>
    %362 = vector.shape_cast %361 : vector<1x8x32xf32> to vector<8x32xf32>
    %cst_231 = arith.constant dense<0.000000e+00> : vector<8x32xf32>
    %363 = tpu.matmul %360, %362, %cst_231 {dimension_numbers = #tpu.dot_dimension_numbers<[1], [0], [0], [1], [0, 0, 1, 1], [], []>} : vector<8x8xf32>, vector<8x32xf32>, vector<8x32xf32> -> vector<8x32xf32>
    %364 = arith.addf %337, %363 : vector<8x32xf32>
    %365 = vector.broadcast %9 : vector<8x1xf32> to vector<8x32xf32>
    %366 = arith.mulf %364, %365 : vector<8x32xf32>
    %cst_232 = arith.constant dense<0.000000e+00> : vector<16x32xf32>
    %367 = tpu.matmul %148, %14, %cst_232 {dimension_numbers = #tpu.dot_dimension_numbers<[1], [0], [0], [1], [0, 0, 1, 1], [], []>} : vector<16x32xf32>, vector<32x32xf32>, vector<16x32xf32> -> vector<16x32xf32>
    %368 = math.tanh %367 : vector<16x32xf32>
    %cst_233 = arith.constant dense<0.000000e+00> : vector<16x1xf32>
    %369 = tpu.matmul %368, %15, %cst_233 {dimension_numbers = #tpu.dot_dimension_numbers<[1], [0], [0], [1], [0, 0, 1, 1], [], []>} : vector<16x32xf32>, vector<32x1xf32>, vector<16x1xf32> -> vector<16x1xf32>
    %cst_234 = arith.constant dense<0xFF800000> : vector<1xf32>
    %370 = vector.multi_reduction <maximumf>, %369, %cst_234 [0] : vector<16x1xf32> to vector<1xf32>
    %371 = vector.shape_cast %370 : vector<1xf32> to vector<1x1xf32>
    %372 = vector.broadcast %371 : vector<1x1xf32> to vector<16x1xf32>
    %373 = arith.subf %369, %372 : vector<16x1xf32>
    %374 = math.exp %373 : vector<16x1xf32>
    %cst_235 = arith.constant dense<0.000000e+00> : vector<1xf32>
    %375 = vector.multi_reduction <add>, %374, %cst_235 [0] : vector<16x1xf32> to vector<1xf32>
    %376 = vector.shape_cast %375 : vector<1xf32> to vector<1x1xf32>
    %377 = tpu.reciprocal %376 {approx = true} : vector<1x1xf32> -> vector<1x1xf32>
    %378 = vector.broadcast %377 : vector<1x1xf32> to vector<16x1xf32>
    %379 = arith.mulf %374, %378 : vector<16x1xf32>
    %380 = vector.broadcast %379 : vector<16x1xf32> to vector<16x32xf32>
    %381 = arith.mulf %380, %148 : vector<16x32xf32>
    %cst_236 = arith.constant dense<0.000000e+00> : vector<32xf32>
    %382 = vector.multi_reduction <add>, %381, %cst_236 [0] : vector<16x32xf32> to vector<32xf32>
    %383 = vector.shape_cast %382 : vector<32xf32> to vector<1x32xf32>
    %cst_237 = arith.constant dense<0.000000e+00> : vector<16x32xf32>
    %384 = tpu.matmul %257, %14, %cst_237 {dimension_numbers = #tpu.dot_dimension_numbers<[1], [0], [0], [1], [0, 0, 1, 1], [], []>} : vector<16x32xf32>, vector<32x32xf32>, vector<16x32xf32> -> vector<16x32xf32>
    %385 = math.tanh %384 : vector<16x32xf32>
    %cst_238 = arith.constant dense<0.000000e+00> : vector<16x1xf32>
    %386 = tpu.matmul %385, %15, %cst_238 {dimension_numbers = #tpu.dot_dimension_numbers<[1], [0], [0], [1], [0, 0, 1, 1], [], []>} : vector<16x32xf32>, vector<32x1xf32>, vector<16x1xf32> -> vector<16x1xf32>
    %cst_239 = arith.constant dense<0xFF800000> : vector<1xf32>
    %387 = vector.multi_reduction <maximumf>, %386, %cst_239 [0] : vector<16x1xf32> to vector<1xf32>
    %388 = vector.shape_cast %387 : vector<1xf32> to vector<1x1xf32>
    %389 = vector.broadcast %388 : vector<1x1xf32> to vector<16x1xf32>
    %390 = arith.subf %386, %389 : vector<16x1xf32>
    %391 = math.exp %390 : vector<16x1xf32>
    %cst_240 = arith.constant dense<0.000000e+00> : vector<1xf32>
    %392 = vector.multi_reduction <add>, %391, %cst_240 [0] : vector<16x1xf32> to vector<1xf32>
    %393 = vector.shape_cast %392 : vector<1xf32> to vector<1x1xf32>
    %394 = tpu.reciprocal %393 {approx = true} : vector<1x1xf32> -> vector<1x1xf32>
    %395 = vector.broadcast %394 : vector<1x1xf32> to vector<16x1xf32>
    %396 = arith.mulf %391, %395 : vector<16x1xf32>
    %397 = vector.broadcast %396 : vector<16x1xf32> to vector<16x32xf32>
    %398 = arith.mulf %397, %257 : vector<16x32xf32>
    %cst_241 = arith.constant dense<0.000000e+00> : vector<32xf32>
    %399 = vector.multi_reduction <add>, %398, %cst_241 [0] : vector<16x32xf32> to vector<32xf32>
    %400 = vector.shape_cast %399 : vector<32xf32> to vector<1x32xf32>
    %cst_242 = arith.constant dense<0.000000e+00> : vector<8x32xf32>
    %401 = tpu.matmul %366, %14, %cst_242 {dimension_numbers = #tpu.dot_dimension_numbers<[1], [0], [0], [1], [0, 0, 1, 1], [], []>} : vector<8x32xf32>, vector<32x32xf32>, vector<8x32xf32> -> vector<8x32xf32>
    %402 = math.tanh %401 : vector<8x32xf32>
    %cst_243 = arith.constant dense<0.000000e+00> : vector<8x1xf32>
    %403 = tpu.matmul %402, %15, %cst_243 {dimension_numbers = #tpu.dot_dimension_numbers<[1], [0], [0], [1], [0, 0, 1, 1], [], []>} : vector<8x32xf32>, vector<32x1xf32>, vector<8x1xf32> -> vector<8x1xf32>
    %cst_244 = arith.constant dense<0xFF800000> : vector<1xf32>
    %404 = vector.multi_reduction <maximumf>, %403, %cst_244 [0] : vector<8x1xf32> to vector<1xf32>
    %405 = vector.shape_cast %404 : vector<1xf32> to vector<1x1xf32>
    %406 = vector.broadcast %405 : vector<1x1xf32> to vector<8x1xf32>
    %407 = arith.subf %403, %406 : vector<8x1xf32>
    %408 = math.exp %407 : vector<8x1xf32>
    %cst_245 = arith.constant dense<0.000000e+00> : vector<1xf32>
    %409 = vector.multi_reduction <add>, %408, %cst_245 [0] : vector<8x1xf32> to vector<1xf32>
    %410 = vector.shape_cast %409 : vector<1xf32> to vector<1x1xf32>
    %411 = tpu.reciprocal %410 {approx = true} : vector<1x1xf32> -> vector<1x1xf32>
    %412 = vector.broadcast %411 : vector<1x1xf32> to vector<8x1xf32>
    %413 = arith.mulf %408, %412 : vector<8x1xf32>
    %414 = vector.broadcast %413 : vector<8x1xf32> to vector<8x32xf32>
    %415 = arith.mulf %414, %366 : vector<8x32xf32>
    %cst_246 = arith.constant dense<0.000000e+00> : vector<32xf32>
    %416 = vector.multi_reduction <add>, %415, %cst_246 [0] : vector<8x32xf32> to vector<32xf32>
    %417 = vector.shape_cast %416 : vector<32xf32> to vector<1x32xf32>
    %418 = arith.mulf %417, %383 : vector<1x32xf32>
    %cst_247 = arith.constant dense<0.000000e+00> : vector<1xf32>
    %419 = vector.multi_reduction <add>, %418, %cst_247 [1] : vector<1x32xf32> to vector<1xf32>
    %420 = vector.shape_cast %419 : vector<1xf32> to vector<1x1xf32>
    %421 = arith.mulf %417, %417 : vector<1x32xf32>
    %cst_248 = arith.constant dense<0.000000e+00> : vector<1xf32>
    %422 = vector.multi_reduction <add>, %421, %cst_248 [1] : vector<1x32xf32> to vector<1xf32>
    %423 = vector.shape_cast %422 : vector<1xf32> to vector<1x1xf32>
    %424 = math.sqrt %423 : vector<1x1xf32>
    %425 = arith.mulf %383, %383 : vector<1x32xf32>
    %cst_249 = arith.constant dense<0.000000e+00> : vector<1xf32>
    %426 = vector.multi_reduction <add>, %425, %cst_249 [1] : vector<1x32xf32> to vector<1xf32>
    %427 = vector.shape_cast %426 : vector<1xf32> to vector<1x1xf32>
    %428 = math.sqrt %427 : vector<1x1xf32>
    %429 = arith.mulf %424, %428 : vector<1x1xf32>
    %cst_250 = arith.constant 9.99999993E-9 : f32
    %430 = vector.broadcast %cst_250 : f32 to vector<1x1xf32>
    %431 = arith.maximumf %429, %430 : vector<1x1xf32>
    %432 = arith.divf %420, %431 : vector<1x1xf32>
    %c0_251 = arith.constant 0 : index
    %c0_252 = arith.constant 0 : index
    %c0_253 = arith.constant 0 : index
    %433 = vector.load %arg14[%c0_251, %c0_252, %c0_253] : memref<1x1x1xf32, #tpu.memory_space<vmem>>, vector<1x1x1xf32>
    %434 = vector.shape_cast %433 : vector<1x1x1xf32> to vector<1x1xf32>
    %435 = vector.shape_cast %432 : vector<1x1xf32> to vector<1x1x1xf32>
    tpu.vector_store %arg14[%c0_251, %c0_252, %c0_253], %435 {strides = array<i32>} : memref<1x1x1xf32, #tpu.memory_space<vmem>>, vector<1x1x1xf32>,
    %436 = arith.mulf %417, %400 : vector<1x32xf32>
    %cst_254 = arith.constant dense<0.000000e+00> : vector<1xf32>
    %437 = vector.multi_reduction <add>, %436, %cst_254 [1] : vector<1x32xf32> to vector<1xf32>
    %438 = vector.shape_cast %437 : vector<1xf32> to vector<1x1xf32>
    %439 = arith.mulf %417, %417 : vector<1x32xf32>
    %cst_255 = arith.constant dense<0.000000e+00> : vector<1xf32>
    %440 = vector.multi_reduction <add>, %439, %cst_255 [1] : vector<1x32xf32> to vector<1xf32>
    %441 = vector.shape_cast %440 : vector<1xf32> to vector<1x1xf32>
    %442 = math.sqrt %441 : vector<1x1xf32>
    %443 = arith.mulf %400, %400 : vector<1x32xf32>
    %cst_256 = arith.constant dense<0.000000e+00> : vector<1xf32>
    %444 = vector.multi_reduction <add>, %443, %cst_256 [1] : vector<1x32xf32> to vector<1xf32>
    %445 = vector.shape_cast %444 : vector<1xf32> to vector<1x1xf32>
    %446 = math.sqrt %445 : vector<1x1xf32>
    %447 = arith.mulf %442, %446 : vector<1x1xf32>
    %cst_257 = arith.constant 9.99999993E-9 : f32
    %448 = vector.broadcast %cst_257 : f32 to vector<1x1xf32>
    %449 = arith.maximumf %447, %448 : vector<1x1xf32>
    %450 = arith.divf %438, %449 : vector<1x1xf32>
    %c0_258 = arith.constant 0 : index
    %c0_259 = arith.constant 0 : index
    %c0_260 = arith.constant 0 : index
    %451 = vector.load %arg15[%c0_258, %c0_259, %c0_260] : memref<1x1x1xf32, #tpu.memory_space<vmem>>, vector<1x1x1xf32>
    %452 = vector.shape_cast %451 : vector<1x1x1xf32> to vector<1x1xf32>
    %453 = vector.shape_cast %450 : vector<1x1xf32> to vector<1x1x1xf32>
    tpu.vector_store %arg15[%c0_258, %c0_259, %c0_260], %453 {strides = array<i32>} : memref<1x1x1xf32, #tpu.memory_space<vmem>>, vector<1x1x1xf32>,
    return
  }
  func.func @transform_0(%arg0: i32) -> (i32, i32, i32) {
    %c0_i32 = arith.constant 0 : i32
    %c0_i32_0 = arith.constant 0 : i32
    %c0_i32_1 = arith.constant 0 : i32
    return %arg0, %c0_i32, %c0_i32_0 : i32, i32, i32
  }
  func.func @transform_1(%arg0: i32) -> (i32, i32, i32) {
    %c0_i32 = arith.constant 0 : i32
    %c0_i32_0 = arith.constant 0 : i32
    %c0_i32_1 = arith.constant 0 : i32
    return %arg0, %c0_i32, %c0_i32_0 : i32, i32, i32
  }
  func.func @transform_2(%arg0: i32) -> (i32, i32, i32) {
    %c0_i32 = arith.constant 0 : i32
    %c0_i32_0 = arith.constant 0 : i32
    %c0_i32_1 = arith.constant 0 : i32
    return %arg0, %c0_i32, %c0_i32_0 : i32, i32, i32
  }
  func.func @transform_3(%arg0: i32) -> (i32, i32, i32) {
    %c0_i32 = arith.constant 0 : i32
    %c0_i32_0 = arith.constant 0 : i32
    %c0_i32_1 = arith.constant 0 : i32
    return %arg0, %c0_i32, %c0_i32_0 : i32, i32, i32
  }
  func.func @transform_4(%arg0: i32) -> (i32, i32, i32) {
    %c0_i32 = arith.constant 0 : i32
    %c0_i32_0 = arith.constant 0 : i32
    %c0_i32_1 = arith.constant 0 : i32
    return %arg0, %c0_i32, %c0_i32_0 : i32, i32, i32
  }
  func.func @transform_5(%arg0: i32) -> (i32, i32, i32) {
    %c0_i32 = arith.constant 0 : i32
    %c0_i32_0 = arith.constant 0 : i32
    %c0_i32_1 = arith.constant 0 : i32
    return %arg0, %c0_i32, %c0_i32_0 : i32, i32, i32
  }
  func.func @transform_6(%arg0: i32) -> (i32, i32, i32) {
    %c0_i32 = arith.constant 0 : i32
    %c0_i32_0 = arith.constant 0 : i32
    %c0_i32_1 = arith.constant 0 : i32
    return %arg0, %c0_i32, %c0_i32_0 : i32, i32, i32
  }
  func.func @transform_7(%arg0: i32) -> (i32, i32, i32) {
    %c0_i32 = arith.constant 0 : i32
    %c0_i32_0 = arith.constant 0 : i32
    %c0_i32_1 = arith.constant 0 : i32
    %c0_i32_2 = arith.constant 0 : i32
    return %c0_i32, %c0_i32_0, %c0_i32_1 : i32, i32, i32
  }
  func.func @transform_8(%arg0: i32) -> (i32, i32, i32) {
    %c0_i32 = arith.constant 0 : i32
    %c0_i32_0 = arith.constant 0 : i32
    %c0_i32_1 = arith.constant 0 : i32
    %c0_i32_2 = arith.constant 0 : i32
    return %c0_i32, %c0_i32_0, %c0_i32_1 : i32, i32, i32
  }
  func.func @transform_9(%arg0: i32) -> (i32, i32, i32) {
    %c0_i32 = arith.constant 0 : i32
    %c0_i32_0 = arith.constant 0 : i32
    %c0_i32_1 = arith.constant 0 : i32
    %c0_i32_2 = arith.constant 0 : i32
    return %c0_i32, %c0_i32_0, %c0_i32_1 : i32, i32, i32
  }
  func.func @transform_10(%arg0: i32) -> (i32, i32, i32) {
    %c0_i32 = arith.constant 0 : i32
    %c0_i32_0 = arith.constant 0 : i32
    %c0_i32_1 = arith.constant 0 : i32
    %c0_i32_2 = arith.constant 0 : i32
    return %c0_i32, %c0_i32_0, %c0_i32_1 : i32, i32, i32
  }
  func.func @transform_11(%arg0: i32) -> (i32, i32) {
    %c0_i32 = arith.constant 0 : i32
    %c0_i32_0 = arith.constant 0 : i32
    %c0_i32_1 = arith.constant 0 : i32
    return %c0_i32, %c0_i32_0 : i32, i32
  }
  func.func @transform_12(%arg0: i32) -> (i32, i32) {
    %c0_i32 = arith.constant 0 : i32
    %c0_i32_0 = arith.constant 0 : i32
    %c0_i32_1 = arith.constant 0 : i32
    return %c0_i32, %c0_i32_0 : i32, i32
  }
  func.func @transform_13(%arg0: i32) -> (i32, i32, i32) {
    %c0_i32 = arith.constant 0 : i32
    %c0_i32_0 = arith.constant 0 : i32
    %c0_i32_1 = arith.constant 0 : i32
    return %arg0, %c0_i32, %c0_i32_0 : i32, i32, i32
  }
  func.func @transform_14(%arg0: i32) -> (i32, i32, i32) {
    %c0_i32 = arith.constant 0 : i32
    %c0_i32_0 = arith.constant 0 : i32
    %c0_i32_1 = arith.constant 0 : i32
    return %arg0, %c0_i32, %c0_i32_0 : i32, i32, i32
  }
}

</mosaic_0001>

<bundles_post_ra>
// kernel: attention_forward.1
= control target key start
LH: loop header
LB: loop body
LE: loop exit
PB: predicated region body
PF: predicated region fallthrough
CT: control target
= control target key end

     0   :  { %s7348_s29 = smov 0   ;;  %s8123_s0 = inlined_call_operand.vmem [shape: f32[2,8,32], index: 0, kind: input, shape index: {}]   ;;  %s8124_s1 = inlined_call_operand.vmem [shape: f32[2,16,32], index: 1, kind: input, shape index: {}]   ;;  %s8125_s2 = inlined_call_operand.vmem [shape: f32[2,16,32], index: 2, kind: input, shape index: {}]   ;;  %s8126_s3 = inlined_call_operand.vmem [shape: f32[2,1,8], index: 3, kind: input, shape index: {}]   ;;  %s8127_s4 = inlined_call_operand.vmem [shape: f32[2,8,1], index: 4, kind: input, shape index: {}]   ;;  %s8128_s5 = inlined_call_operand.vmem [shape: f32[2,16,1], index: 5, kind: input, shape index: {}]   ;;  %s8129_s6 = inlined_call_operand.vmem [shape: f32[2,16,1], index: 6, kind: input, shape index: {}]   ;;  %s8130_s7 = inlined_call_operand.vmem [shape: f32[4,32,8], index: 7, kind: input, shape index: {}]   ;;  %s8131_s8 = inlined_call_operand.vmem [shape: f32[4,32,8], index: 8, kind: input, shape index: {}]   ;;  %s8132_s9 = inlined_call_operand.vmem [shape: f32[4,32,8], index: 9, kind: input, shape index: {}]   ;;  %s8133_s10 = inlined_call_operand.vmem [shape: f32[4,8,32], index: 10, kind: input, shape index: {}]   ;;  %s8134_s11 = inlined_call_operand.vmem [shape: f32[32,32], index: 11, kind: input, shape index: {}]   ;;  %s8135_s12 = inlined_call_operand.vmem [shape: f32[32,1], index: 12, kind: input, shape index: {}]   ;;  %s8136_s13 = inlined_call_operand.vmem [shape: f32[2,1,1], index: 13, kind: output, shape index: {0}]   ;;  %s8137_s14 = inlined_call_operand.vmem [shape: f32[2,1,1], index: 14, kind: output, shape index: {1}]  }
   0x1 LB: > { %s6057_s30 = sadd.s32 4294967295, %s7267_s29   ;;  %p6061_p0 = scmp.ge.s32.totalorder %s7267_s29, 1  ;;  %s7267_s29 = sphi %s7348_s29, %s25_s29  }
   0x2   : > { %p471_p1 = scmp.lt.s32.totalorder %s7267_s29, 3 }
   0x4   : > { %p472_p2 = pnand %p6061_p0, %p471_p1 }
   0x5   : > { %v600_v0 = vld [vmem:[%s8131_s8] sm:$0xff] (!%p472_p2)  ;;  %v601_v1 = vld [vmem:[%s8131_s8 + $0x8] sm:$0xff] (!%p472_p2)  ;;  %v602_v2 = vld [vmem:[%s8131_s8 + $0x10] sm:$0xff] (!%p472_p2)  ;;  %v7269_v3 = vmov (!%p472_p2), 0.0|0.0   ;;  %vm7270_vm0 = vmmov (!%p472_p2), 0   ;;  %v7271_v6 = vmov (!%p472_p2), 0.0  }
   0x6   : > { %475 = sbr.rel (%p472_p2) target bundleno = 9865 (0x2689), region = 72  ;;  %6931 = vmatprep.subr.bf16.mxu0 (!%p472_p2), %v7269_v3  ;;  %v6932_v4 = vpack.c.bf16 (!%p472_p2), %v601_v1, %v600_v0  ;;  %v603_v5 = vld [vmem:[%s8131_s8 + $0x18] sm:$0xff] (!%p472_p2)  ;;  %6473 = vmatprep.mubr.msk.f32.mxu0 (!%p472_p2), %vm7270_vm0, %v7271_v6  ;;  %p544_p3 = scmp.lt.s32.totalorder (!%p472_p2), %s6057_s30, 1  ;;  %v7272_v8 = vmov (!%p472_p2), 0   ;;  %v6078_v9 = vld [vmem:[%s8131_s8 + $0x40] sm:$0xff] (!%p472_p2)  ;;  %v6079_v10 = vld [vmem:[%s8131_s8 + $0x48] sm:$0xff] (!%p472_p2) }
   0x7   : > { %6937 = vmatprep.subr.bf16.mxu1 (!%p472_p2), %v7269_v3  ;;  %6484 = vmatprep.mubr.msk.f32.mxu1 (!%p472_p2), %vm7270_vm0, %v7271_v6  ;;  %v6935_v7 = vpack.c.bf16 (!%p472_p2), %v603_v5, %v602_v2  ;;  %vm604_vm1 = vcmask (!%p472_p2), 261120   ;;  %v6944_v12 = vpack.c.bf16 (!%p472_p2), %v6079_v10, %v6078_v9  ;;  %v6073_v13 = vld [vmem:[%s8131_s8 + $0x20] sm:$0xff] (!%p472_p2)  ;;  %v6074_v14 = vld [vmem:[%s8131_s8 + $0x28] sm:$0xff] (!%p472_p2)  ;;  %v6080_v15 = vld [vmem:[%s8131_s8 + $0x50] sm:$0xff] (!%p472_p2)  ;;  %vm1287_vm2 = vcmask (!%p472_p2), 64512  }
   0x8   : > { %6933 = vmatpush3.bf16.msra.mxu0 (!%p472_p2), %v6932_v4  ;;  %7141 = vset.pattern.permute.xlu0 (!%p472_p2), %v7272_v8  ;;  %v6081_v16 = vld [vmem:[%s8131_s8 + $0x58] sm:$0xff] (!%p472_p2)  ;;  %v6938_v17 = vpack.c.bf16 (!%p472_p2), %v6074_v14, %v6073_v13  ;;  %v6075_v18 = vld [vmem:[%s8131_s8 + $0x30] sm:$0xff] (!%p472_p2)  ;;  %v6083_v22 = vld [vmem:[%s8131_s8 + $0x60] sm:$0xff] (!%p472_p2)  ;;  %vm5424_vm5 = vcmask (!%p472_p2), 7168   ;;  %vm5894_vm12 = vcmask (!%p472_p2), 0  }
   0x9   : > { %6934 = vmatprep.subr.bf16.mxu0 (!%p472_p2), %v7269_v3  ;;  %7142 = vset.pattern.permute.xlu1 (!%p472_p2), %v7272_v8  ;;  %v6076_v19 = vld [vmem:[%s8131_s8 + $0x38] sm:$0xff] (!%p472_p2)  ;;  %v6947_v21 = vpack.c.bf16 (!%p472_p2), %v6081_v16, %v6080_v15  ;;  %v6084_v23 = vld [vmem:[%s8131_s8 + $0x68] sm:$0xff] (!%p472_p2)  ;;  %v903_v24 = vld [vmem:[%s8132_s9] sm:$0xff] (!%p472_p2) }
   0xa   : > { %6939 = vmatpush3.bf16.msra.mxu1 (!%p472_p2), %v6938_v17  ;;  %v6941_v20 = vpack.c.bf16 (!%p472_p2), %v6076_v19, %v6075_v18  ;;  %v904_v25 = vld [vmem:[%s8132_s9 + $0x8] sm:$0xff] (!%p472_p2)  ;;  %v6950_v26 = vpack.c.bf16 (!%p472_p2), %v6084_v23, %v6083_v22  ;;  %v6085_v28 = vld [vmem:[%s8131_s8 + $0x70] sm:$0xff] (!%p472_p2)  ;;  %v6086_v29 = vld [vmem:[%s8131_s8 + $0x78] sm:$0xff] (!%p472_p2) }
   0xb   : > { %6940 = vmatprep.subr.bf16.mxu1 (!%p472_p2), %v7269_v3  ;;  %v6956_v27 = vpack.c.bf16 (!%p472_p2), %v904_v25, %v903_v24  ;;  %v905_v30 = vld [vmem:[%s8132_s9 + $0x10] sm:$0xff] (!%p472_p2)  ;;  %v906_v31 = vld [vmem:[%s8132_s9 + $0x18] sm:$0xff] (!%p472_p2)  ;;  %v6953_v32 = vpack.c.bf16 (!%p472_p2), %v6086_v29, %v6085_v28  ;;  %v6089_v34 = vld [vmem:[%s8132_s9 + $0x20] sm:$0xff] (!%p472_p2)  ;;  %v1376_v24 = vlaneseq (!%p472_p2) }
   0xc   : > { %6936 = vmatpush3.bf16.msra.mxu0 (!%p472_p2), %v6935_v7  ;;  %v6959_v33 = vpack.c.bf16 (!%p472_p2), %v906_v31, %v905_v30  ;;  %v6090_v35 = vld [vmem:[%s8132_s9 + $0x28] sm:$0xff] (!%p472_p2)  ;;  %v6094_v36 = vld [vmem:[%s8132_s9 + $0x40] sm:$0xff] (!%p472_p2)  ;;  %v6091_v40 = vld [vmem:[%s8132_s9 + $0x30] sm:$0xff] (!%p472_p2) }
   0xd   : > { %s8139_s30 = smov (!%p544_p3, %s6057_s30), 1  ;;  %6943 = vmatprep.subr.bf16.mxu0 %v7269_v3  ;;  %v6095_v37 = vld [vmem:[%s8132_s9 + $0x48] sm:$0xff]  ;;  %v6962_v38 = vpack.c.bf16 %v6090_v35, %v6089_v34  ;;  %v6092_v41 = vld [vmem:[%s8132_s9 + $0x38] sm:$0xff]  ;;  %v6096_v42 = vld [vmem:[%s8132_s9 + $0x50] sm:$0xff] }
   0xe   : > { %s6062_s27 = sshll.u32 %s8139_s30, 3  ;;  %6942 = vmatpush3.bf16.msra.mxu1 %v6941_v20  ;;  %v6968_v39 = vpack.c.bf16 %v6095_v37, %v6094_v36  ;;  %v6097_v43 = vld [vmem:[%s8132_s9 + $0x58] sm:$0xff]  ;;  %v1202_v44 = vld [vmem:[%s8130_s7] sm:$0xff]  ;;  %v1203_v45 = vld [vmem:[%s8130_s7 + $0x8] sm:$0xff]  ;;  %s7494_s17 = sshll.u32 %s8139_s30, 4  ;;  %v6965_v46 = vpack.c.bf16 %v6092_v41, %v6091_v40 }
   0xf   : > { %s7391_s16 = scalar_lea.vmem %s8123_s0, %s6062_s27  ;;  %6949 = vmatprep.subr.bf16.mxu1 %v7269_v3  ;;  %v6971_v47 = vpack.c.bf16 %v6097_v43, %v6096_v42  ;;  %v6099_v48 = vld [vmem:[%s8132_s9 + $0x60] sm:$0xff]  ;;  %v6100_v49 = vld [vmem:[%s8132_s9 + $0x68] sm:$0xff]  ;;  %v7505_v50 = vpack.c.bf16 %v1203_v45, %v1202_v44  ;;  %v1204_v51 = vld [vmem:[%s8130_s7 + $0x10] sm:$0xff]  ;;  %s552_s15 = scalar_lea.vmem %s8124_s1, %s7494_s17 }
  0x10   : > { %v7394_v11 = vld [vmem:[%s7391_s16] sm:$0xff]  ;;  %v1205_v52 = vld [vmem:[%s8130_s7 + $0x18] sm:$0xff]  ;;  %v6974_v53 = vpack.c.bf16 %v6100_v49, %v6099_v48  ;;  %v6101_v54 = vld [vmem:[%s8132_s9 + $0x70] sm:$0xff]  ;;  %s560_s23 = scalar_lea.vmem %s8126_s3, %s8139_s30  ;;  %s557_s24 = scalar_lea.vmem %s8125_s2, %s7494_s17 }
  0x11   : > { %6474 = vmatmul.mubr.msk.f32.vlgmr.msra.gmra.mrb[0].mxu0 %vm604_vm1, %v7394_v11  ;;  %6485 = vmatmul.mubr.msk.f32.vlgmr.msra.gmra.mrb[0].mxu1 %vm604_vm1, %v7394_v11  ;;  %v6102_v55 = vld [vmem:[%s8132_s9 + $0x78] sm:$0xff]  ;;  %v7528_v56 = vpack.c.bf16 %v1205_v52, %v1204_v51  ;;  %v7530_v57 = vld [vmem:[%s552_s15] sm:$0xff]  ;;  %v7544_v59 = vld [vmem:[%s552_s15 + $0x8] sm:$0xff]  ;;  %s569_s19 = scalar_lea.vmem %s8128_s5, %s7494_s17  ;;  %s574_s18 = scalar_lea.vmem %s8129_s6, %s7494_s17 }
  0x12   : > { %6945 = vmatpush3.bf16.msra.mxu0 %v6944_v12  ;;  %6495 = vmatprep.mubr.msk.f32.mxu0 %vm7270_vm0, %v7271_v6  ;;  %v6977_v58 = vpack.c.bf16 %v6102_v55, %v6101_v54  ;;  %v6111_v60 = vld [vmem:[%s8130_s7 + $0x20] sm:$0xff]  ;;  %v6112_v61 = vld [vmem:[%s8130_s7 + $0x28] sm:$0xff]  ;;  %v6113_v63 = vld [vmem:[%s8130_s7 + $0x30] sm:$0xff]  ;;  %s580_s20 = scalar_lea.vmem %s8137_s14, %s8139_s30 }
  0x13   : > { %6946 = vmatprep.subr.bf16.mxu0 %v7269_v3  ;;  %6951 = vmatpush3.bf16.msra.mxu1 %v6950_v26  ;;  %v7558_v62 = vpack.c.bf16 %v6112_v61, %v6111_v60  ;;  %v6114_v0 = vld [vmem:[%s8130_s7 + $0x38] sm:$0xff]  ;;  %v7575_v2 = vld [vmem:[%s8133_s10] sm:$0xff]  ;;  %v1377_v26 = vshrl.u32 %v1376_v24, 7 }
  0x14   : > { %6952 = vmatprep.subr.bf16.mxu1 %v7269_v3  ;;  %6506 = vmatprep.mubr.msk.f32.mxu1 %vm7270_vm0, %v7271_v6  ;;  %v7568_v1 = vpack.c.bf16 %v6114_v0, %v6113_v63  ;;  %v586_v25 = vld [vmem:[%s560_s23] sm:$0x1] }
  0x15   : > { %vm1374_vm3 = vcmp.gt.f32.partialorder %v586_v25, 0.0 }
  0x16   : > { %6948 = vmatpush3.bf16.msra.mxu0 %v6947_v21  ;;  %v1375_v28 = vsel %vm1374_vm3, 1, %v7272_v8 }
  0x17   : > { %6955 = vmatprep.subr.bf16.mxu0 %v7269_v3  ;;  %6954 = vmatpush3.bf16.msra.mxu1 %v6953_v32 }
  0x18   : > { %6961 = vmatprep.subr.bf16.mxu1 %v7269_v3 }
  0x19   : > { %6496 = vmatmul.mubr.msk.f32.vlgmr.msra.gmra.mrb[2].mxu0 %vm604_vm1, %v7394_v11 }
  0x1a   : > { %6957 = vmatpush3.bf16.msra.mxu0 %v6956_v27  ;;  %6517 = vmatprep.mubr.msk.f32.mxu0 %vm7270_vm0, %v7271_v6  ;;  %v1378_v27 = vsub.s32 0, %v1377_v26 }
  0x1b   : > { %6958 = vmatprep.subr.bf16.mxu0 %v7269_v3  ;;  %6507 = vmatmul.mubr.msk.f32.vlgmr.msra.gmra.mrb[2].mxu1 %vm604_vm1, %v7394_v11 }
  0x1c   : > { %6963 = vmatpush3.bf16.msra.mxu1 %v6962_v38  ;;  %6528 = vmatprep.mubr.msk.f32.mxu1 %vm7270_vm0, %v7271_v6  ;;  %v7614_v29 = vrot.slane %v1375_v28, %v1378_v27 }
  0x1d   : > { %6964 = vmatprep.subr.bf16.mxu1 %v7269_v3 }
  0x1e   : > { %6960 = vmatpush3.bf16.msra.mxu0 %v6959_v33  ;;  %vm1380_vm4 = vcmp.eq.s32.totalorder %v7614_v29, 1 }
  0x1f   : > { %6967 = vmatprep.subr.bf16.mxu0 %v7269_v3 }
  0x20   : > { %6966 = vmatpush3.bf16.msra.mxu1 %v6965_v46 }
  0x21   : > { %6518 = vmatmul.mubr.msk.f32.vlgmr.msra.gmra.mrb[4].mxu0 %vm604_vm1, %v7394_v11  ;;  %6973 = vmatprep.subr.bf16.mxu1 %v7269_v3 }
  0x22   : > { %6969 = vmatpush3.bf16.msra.mxu0 %v6968_v39  ;;  %6539 = vmatprep.mubr.msk.f32.mxu0 %vm7270_vm0, %v7271_v6 }
  0x23   : > { %6970 = vmatprep.subr.bf16.mxu0 %v7269_v3  ;;  %6529 = vmatmul.mubr.msk.f32.vlgmr.msra.gmra.mrb[4].mxu1 %vm604_vm1, %v7394_v11 }
  0x24   : > { %6975 = vmatpush3.bf16.msra.mxu1 %v6974_v53  ;;  %6550 = vmatprep.mubr.msk.f32.mxu1 %vm7270_vm0, %v7271_v6 }
  0x25   : > { %6976 = vmatprep.subr.bf16.mxu1 %v7269_v3 }
  0x26   : > { %6972 = vmatpush3.bf16.msra.mxu0 %v6971_v47 }
  0x27   : > { %6980 = vmatprep.subr.bf16.mxu0 %v7505_v50 }
  0x28   : > { %6978 = vmatpush3.bf16.msra.mxu1 %v6977_v58 }
  0x29   : > { %6540 = vmatmul.mubr.msk.f32.vlgmr.msra.gmra.mrb[6].mxu0 %vm604_vm1, %v7394_v11 }
  0x2a   : > { %6982 = vmatpush3.bf16.msra.mxu0 %v7505_v50  ;;  %6561 = vmatprep.mubr.msk.f32.mxu0 %vm604_vm1, %v7530_v57 }
  0x2b   : > { %6984 = vmatprep.subr.bf16.mxu0 %v7528_v56  ;;  %6551 = vmatmul.mubr.msk.f32.vlgmr.msra.gmra.mrb[6].mxu1 %vm604_vm1, %v7394_v11 }
  0x2e   : > { %6986 = vmatpush3.bf16.msra.mxu0 %v7528_v56 }
  0x2f   : > { %6988 = vmatprep.subr.bf16.mxu0 %v7558_v62 }
  0x31   : > { %6562 = vmatmul.mubr.msk.f32.vlgmr.msra.gmra.mrb[8].mxu0 %vm604_vm1, %v7544_v59 }
  0x32   : > { %6582 = vmatprep.mubr.msk.f32.mxu0 %vm604_vm1, %v7530_v57  ;;  %6990 = vmatpush3.bf16.msra.mxu0 %v7558_v62 }
  0x33   : > { %6992 = vmatprep.subr.bf16.mxu0 %v7568_v1 }
  0x36   : > { %6994 = vmatpush3.bf16.msra.mxu0 %v7568_v1 }
  0x37   : > { %6600 = vmatprep.subr.mxu0 %v7575_v2 }
  0x39   : > { %6583 = vmatmul.mubr.msk.f32.vlgmr.msra.gmra.mrb[10].mxu0 %vm604_vm1, %v7544_v59 }
  0x3a   : > { %6601 = vmatpush3.msra.mxu0 %v7575_v2 }
  0xe4   : > { %v7581_v4 = vpop.f32.mrb[0].mxu0  ;;  %v7587_v7 = vpop.f32.mrb[0].mxu1 }
  0xe5   : > { %v6475_v5 = vpop.f32.mrb[1].mxu0  ;;  %6564 = vmatprep.subr.msk.mxu1 %vm1287_vm2, %v7581_v4  ;;  %v6486_v10 = vpop.f32.mrb[1].mxu1 }
  0xe6   : > { %6565 = vmatpush3.xpose.msk.msra.mxu1 %vm1287_vm2, %v7581_v4 }
  0xec   : > { %v7589_v9 = vpop.f32.mrb[2].mxu0 }
  0xed   : > { %v6497_v11 = vpop.f32.mrb[3].mxu0  ;;  %6616 = vmatprep.subr.msk.mxu0 %vm1287_vm2, %v7589_v9 }
  0xee   : > { %v7593_v12 = vpop.f32.mrb[2].mxu1 }
  0xef   : > { %v6508_v14 = vpop.f32.mrb[3].mxu1 }
  0xf4   : > { %v7595_v13 = vpop.f32.mrb[4].mxu0 }
  0xf5   : > { %v6519_v15 = vpop.f32.mrb[5].mxu0  ;;  %6569 = vmatprep.subr.mxu1 %v7595_v13 }
  0xf6   : > { %v7598_v16 = vpop.f32.mrb[4].mxu1 }
  0xf7   : > { %v6530_v18 = vpop.f32.mrb[5].mxu1 }
  0xfc   : > { %v7600_v17 = vpop.f32.mrb[6].mxu0 }
  0xfd   : > { %v6541_v19 = vpop.f32.mrb[7].mxu0 }
  0xfe   : > { %v7602_v20 = vpop.f32.mrb[6].mxu1 }
  0xff   : > { %v6552_v22 = vpop.f32.mrb[7].mxu1 }
 0x104   : > { %v6563_v21 = vpop.f32.mrb[8].mxu0 }
 0x105   : > { %v1278_v23 = vpop.f32.mrb[9].mxu0 }
 0x106   : > { %6566 = vmatprep.mubr.msk.f32.mxu1 %vm1287_vm2, %v1278_v23 }
 0x107   : > { %6567 = vmatmul.mubr.msk.f32.vlgmr.msra.gmra.mrb[8].mxu1 %vm1287_vm2, %v6563_v21 }
 0x108   : > { %6570 = vmatpush3.msra.mxu1 %v7595_v13 }
 0x109   : > { %6585 = vmatprep.subr.msk.mxu1 %vm1287_vm2, %v7587_v7 }
 0x10c   : > { %v6584_v47 = vpop.f32.mrb[10].mxu0 }
 0x10d   : > { %v1558_v48 = vpop.f32.mrb[11].mxu0 }
 0x1da   : > { %v6568_v30 = vpop.f32.mrb[8].mxu1 }
 0x1db   : > { %v1363_v31 = vpop.f32.mrb[9].mxu1  ;;  %v1373_v32 = vmul.f32 0.35355338, %v6568_v30  ;;  %v7648_v30 = vld [vmem:[%s8133_s10 + $0x8] sm:$0xff] }
 0x1dc   : > { %v1372_v33 = vmul.f32 0.35355338, %v1363_v31 }
 0x1dd   : > { %v1382_v36 = vsel %vm1380_vm4, %v1373_v32, -1e+09 }
 0x1de   : > { %v1381_v34 = vsel %vm1380_vm4, %v1372_v33, -1e+09  ;;  %v1386_v37 = vsel %vm1287_vm2, %v1382_v36, -inf }
 0x1df   : > { %v1383_v35 = vsel %vm1287_vm2, %v1381_v34, -inf }
 0x1e0   : > { %1384 = vmax.xlane.f32.xlu0 %v1383_v35 }
 0x1e4   : > { %1387 = vmax.xlane.f32.xlu0 %v1386_v37  ;;  %v6127_v37 = vld [vmem:[%s8130_s7 + $0x40] sm:$0xff] }
 0x26d   : > { %v1385_v8 = vpop.xlane.xlu0 %1384 }
 0x26e   : > { %v1389_v38 = vsub.f32 %v1381_v34, %v1385_v8  ;;  %v6128_v8 = vld [vmem:[%s8130_s7 + $0x48] sm:$0xff] }
 0x270   : > { %v1391_v39 = vmul.f32 1.442695, %v1389_v38  ;;  %v7660_v38 = vpack.c.bf16 %v6128_v8, %v6127_v37 }
 0x271   : > { %v1388_v40 = vpop.xlane.xlu0 %1387 }
 0x272   : > { %7143 = vpow2.f32 %v1391_v39  ;;  %v1390_v41 = vsub.f32 %v1382_v36, %v1388_v40  ;;  %v6129_v39 = vld [vmem:[%s8130_s7 + $0x50] sm:$0xff]  ;;  %v6130_v40 = vld [vmem:[%s8130_s7 + $0x58] sm:$0xff] }
 0x274   : > { %v1393_v42 = vmul.f32 1.442695, %v1390_v41 }
 0x276   : > { %7145 = vpow2.f32 %v1393_v42 }
 0x27c   : > { %v7144_v43 = vpop.eup %7143 }
 0x27d   : > { %v1395_v44 = vsel %vm1287_vm2, %v7144_v43, 0.0 }
 0x27e   : > { %1396 = vadd.xlane.f32.xlu1 %v1395_v44  ;;  %v7685_v44 = vld [vmem:[%s8133_s10 + $0x10] sm:$0xff] }
 0x280   : > { %v7146_v45 = vpop.eup %7145 }
 0x281   : > { %v1398_v46 = vsel %vm1287_vm2, %v7146_v45, 0.0 }
 0x282   : > { %1399 = vadd.xlane.f32.xlu1 %v1398_v46 }
 0x30b   : > { %v1397_v49 = vpop.xlane.xlu1 %1396 }
 0x30c   : > { %7147 = vrcp.f32 %v1397_v49 }
 0x30f   : > { %v1400_v51 = vpop.xlane.xlu1 %1399 }
 0x310   : > { %7149 = vrcp.f32 %v1400_v51 }
 0x316   : > { %v7148_v52 = vpop.eup %7147 }
 0x317   : > { %v1403_v53 = vmul.f32 %v7148_v52, %v7144_v43  ;;  %v7669_v43 = vpack.c.bf16 %v6130_v40, %v6129_v39 }
 0x319   : > { %6571 = vmatprep.mubr.msk.f32.mxu1 %vm1287_vm2, %v1403_v53 }
 0x31a   : > { %v7150_v54 = vpop.eup %7149 }
 0x31b   : > { %v1404_v55 = vmul.f32 %v7150_v54, %v7146_v45 }
 0x31d   : > { %6572 = vmatmul.mubr.msk.f32.vlgmr.msra.gmra.mrb[10].mxu1 %vm1287_vm2, %v1404_v55 }
 0x31e   : > { %6586 = vmatpush3.xpose.msk.msra.mxu1 %vm1287_vm2, %v7587_v7  ;;  %6587 = vmatprep.mubr.msk.f32.mxu1 %vm1287_vm2, %v1558_v48 }
 0x31f   : > { %6590 = vmatprep.subr.mxu1 %v7598_v16 }
 0x321   : > { %6588 = vmatmul.mubr.msk.f32.vlgmr.msra.gmra.mrb[12].mxu1 %vm1287_vm2, %v6584_v47 }
 0x322   : > { %6591 = vmatpush3.msra.mxu1 %v7598_v16 }
 0x323   : > { %6595 = vmatprep.subr.mxu1 %v7648_v30 }
 0x3f0   : > { %v6573_v58 = vpop.f32.mrb[10].mxu1 }
 0x3f1   : > { %v1477_v60 = vpop.f32.mrb[11].mxu1 }
 0x3f2   : > { %6602 = vmatprep.mubr.msk.f32.mxu0 %vm1287_vm2, %v1477_v60 }
 0x3f3   : > { %6603 = vmatmul.mubr.msk.f32.vlgmr.msra.gmra.mrb[12].mxu0 %vm1287_vm2, %v6573_v58 }
 0x3f4   : > { %6617 = vmatpush3.xpose.msk.msra.mxu0 %vm1287_vm2, %v7589_v9  ;;  %v6589_v61 = vpop.f32.mrb[12].mxu1 }
 0x3f5   : > { %v1652_v63 = vmul.f32 0.35355338, %v6589_v61  ;;  %v1642_v0 = vpop.f32.mrb[13].mxu1  ;;  %6626 = vmatprep.subr.mxu0 %v7685_v44 }
 0x3f6   : > { %v1651_v5 = vmul.f32 0.35355338, %v1642_v0 }
 0x3f7   : > { %v1654_v10 = vsel %vm1380_vm4, %v1652_v63, -1e+09 }
 0x3f8   : > { %v1658_v11 = vsel %vm1287_vm2, %v1654_v10, -inf  ;;  %v1653_v14 = vsel %vm1380_vm4, %v1651_v5, -1e+09 }
 0x3f9   : > { %1659 = vmax.xlane.f32.xlu1 %v1658_v11  ;;  %v1655_v15 = vsel %vm1287_vm2, %v1653_v14, -inf }
 0x3fa   : > { %1656 = vmax.xlane.f32.xlu0 %v1655_v15 }
 0x486   : > { %v1660_v18 = vpop.xlane.xlu1 %1659 }
 0x487   : > { %v1662_v19 = vsub.f32 %v1654_v10, %v1660_v18  ;;  %v1657_v21 = vpop.xlane.xlu0 %1656 }
 0x488   : > { %v1661_v22 = vsub.f32 %v1653_v14, %v1657_v21  ;;  %v6141_v21 = vld [vmem:[%s8130_s7 + $0x60] sm:$0xff] }
 0x489   : > { %v1665_v23 = vmul.f32 1.442695, %v1662_v19 }
 0x48a   : > { %v1663_v24 = vmul.f32 1.442695, %v1661_v22  ;;  %v6142_v22 = vld [vmem:[%s8130_s7 + $0x68] sm:$0xff] }
 0x48b   : > { %7151 = vpow2.f32 %v1665_v23  ;;  %v7711_v23 = vpack.c.bf16 %v6142_v22, %v6141_v21 }
 0x48c   : > { %7153 = vpow2.f32 %v1663_v24 }
 0x495   : > { %v7152_v25 = vpop.eup %7151 }
 0x496   : > { %v7154_v26 = vpop.eup %7153  ;;  %v1670_v27 = vsel %vm1287_vm2, %v7152_v25, 0.0 }
 0x497   : > { %1671 = vadd.xlane.f32.xlu1 %v1670_v27  ;;  %v1667_v28 = vsel %vm1287_vm2, %v7154_v26, 0.0  ;;  %v6143_v27 = vld [vmem:[%s8130_s7 + $0x70] sm:$0xff] }
 0x498   : > { %1668 = vadd.xlane.f32.xlu0 %v1667_v28  ;;  %v6144_v28 = vld [vmem:[%s8130_s7 + $0x78] sm:$0xff] }
 0x524   : > { %v1672_v31 = vpop.xlane.xlu1 %1671 }
 0x525   : > { %7155 = vrcp.f32 %v1672_v31  ;;  %v1669_v32 = vpop.xlane.xlu0 %1668 }
 0x526   : > { %7157 = vrcp.f32 %v1669_v32 }
 0x52f   : > { %v7156_v33 = vpop.eup %7155 }
 0x530   : > { %v7158_v34 = vpop.eup %7157  ;;  %v1676_v36 = vmul.f32 %v7156_v33, %v7152_v25 }
 0x531   : > { %v1675_v35 = vmul.f32 %v7158_v34, %v7154_v26  ;;  %v7720_v34 = vpack.c.bf16 %v6144_v28, %v6143_v27 }
 0x533   : > { %6592 = vmatprep.mubr.msk.f32.mxu1 %vm1287_vm2, %v1675_v35  ;;  %v7734_v35 = vld [vmem:[%s557_s24] sm:$0xff] }
 0x534   : > { %6593 = vmatmul.mubr.msk.f32.vlgmr.msra.gmra.mrb[14].mxu1 %vm1287_vm2, %v1676_v36 }
 0x535   : > { %6596 = vmatpush3.msra.mxu1 %v7648_v30 }
 0x536   : > { %6996 = vmatprep.subr.bf16.mxu1 %v7660_v38 }
 0x607   : > { %v6594_v41 = vpop.f32.mrb[14].mxu1 }
 0x608   : > { %v1749_v42 = vpop.f32.mrb[15].mxu1 }
 0x609   : > { %6597 = vmatprep.mubr.msk.f32.mxu1 %vm1287_vm2, %v1749_v42 }
 0x60a   : > { %6598 = vmatmul.mubr.msk.f32.vlgmr.msra.gmra.mrb[16].mxu1 %vm1287_vm2, %v6594_v41 }
 0x60b   : > { %6998 = vmatpush3.bf16.msra.mxu1 %v7660_v38  ;;  %6613 = vmatprep.mubr.msk.f32.mxu1 %vm604_vm1, %v7530_v57 }
 0x60c   : > { %7000 = vmatprep.subr.bf16.mxu1 %v7669_v43 }
 0x60f   : > { %7002 = vmatpush3.bf16.msra.mxu1 %v7669_v43 }
 0x610   : > { %6621 = vmatprep.subr.mxu1 %v7600_v17 }
 0x612   : > { %6614 = vmatmul.mubr.msk.f32.vlgmr.msra.gmra.mrb[18].mxu1 %vm604_vm1, %v7544_v59 }
 0x613   : > { %6622 = vmatpush3.msra.mxu1 %v7600_v17 }
 0x614   : > { %7004 = vmatprep.subr.bf16.mxu1 %v7711_v23 }
 0x6dd   : > { %v7688_v45 = vpop.f32.mrb[16].mxu1 }
 0x6de   : > { %v7690_v46 = vpop.f32.mrb[17].mxu1 }
 0x6e5   : > { %v6615_v47 = vpop.f32.mrb[18].mxu1 }
 0x6e6   : > { %v1993_v48 = vpop.f32.mrb[19].mxu1 }
 0x6e7   : > { %6618 = vmatprep.mubr.msk.f32.mxu0 %vm1287_vm2, %v1993_v48 }
 0x6e8   : > { %6619 = vmatmul.mubr.msk.f32.vlgmr.msra.gmra.mrb[14].mxu0 %vm1287_vm2, %v6615_v47 }
 0x6e9   : > { %6627 = vmatpush3.msra.mxu0 %v7685_v44 }
 0x6ea   : > { %6642 = vmatprep.subr.msk.mxu0 %vm1287_vm2, %v7593_v12 }
 0x7bb   : > { %v6620_v49 = vpop.f32.mrb[14].mxu0 }
 0x7bc   : > { %v2087_v51 = vmul.f32 0.35355338, %v6620_v49  ;;  %v2077_v52 = vpop.f32.mrb[15].mxu0 }
 0x7bd   : > { %v2086_v53 = vmul.f32 0.35355338, %v2077_v52 }
 0x7be   : > { %v2089_v54 = vsel %vm1380_vm4, %v2087_v51, -1e+09 }
 0x7bf   : > { %v2093_v55 = vsel %vm1287_vm2, %v2089_v54, -inf  ;;  %v2088_v58 = vsel %vm1380_vm4, %v2086_v53, -1e+09 }
 0x7c0   : > { %2094 = vmax.xlane.f32.xlu1 %v2093_v55  ;;  %v2090_v60 = vsel %vm1287_vm2, %v2088_v58, -inf }
 0x7c1   : > { %2091 = vmax.xlane.f32.xlu0 %v2090_v60 }
 0x84d   : > { %v2095_v61 = vpop.xlane.xlu1 %2094 }
 0x84e   : > { %v2097_v63 = vsub.f32 %v2089_v54, %v2095_v61  ;;  %v2092_v0 = vpop.xlane.xlu0 %2091 }
 0x84f   : > { %v2096_v5 = vsub.f32 %v2088_v58, %v2092_v0 }
 0x850   : > { %v2100_v10 = vmul.f32 1.442695, %v2097_v63 }
 0x851   : > { %v2098_v11 = vmul.f32 1.442695, %v2096_v5 }
 0x852   : > { %7159 = vpow2.f32 %v2100_v10  ;;  %v7770_v10 = vld [vmem:[%s8133_s10 + $0x18] sm:$0xff] }
 0x853   : > { %7161 = vpow2.f32 %v2098_v11 }
 0x85c   : > { %v7160_v14 = vpop.eup %7159 }
 0x85d   : > { %v7162_v15 = vpop.eup %7161  ;;  %v2105_v18 = vsel %vm1287_vm2, %v7160_v14, 0.0 }
 0x85e   : > { %2106 = vadd.xlane.f32.xlu1 %v2105_v18  ;;  %v2102_v19 = vsel %vm1287_vm2, %v7162_v15, 0.0 }
 0x85f   : > { %2103 = vadd.xlane.f32.xlu0 %v2102_v19 }
 0x8eb   : > { %v2107_v24 = vpop.xlane.xlu1 %2106 }
 0x8ec   : > { %7163 = vrcp.f32 %v2107_v24  ;;  %v2104_v25 = vpop.xlane.xlu0 %2103 }
 0x8ed   : > { %7165 = vrcp.f32 %v2104_v25 }
 0x8f6   : > { %v7164_v26 = vpop.eup %7163 }
 0x8f7   : > { %v7166_v31 = vpop.eup %7165  ;;  %v2111_v33 = vmul.f32 %v7164_v26, %v7160_v14 }
 0x8f8   : > { %v2110_v32 = vmul.f32 %v7166_v31, %v7162_v15 }
 0x8fa   : > { %6623 = vmatprep.mubr.msk.f32.mxu1 %vm1287_vm2, %v2110_v32 }
 0x8fb   : > { %6624 = vmatmul.mubr.msk.f32.vlgmr.msra.gmra.mrb[20].mxu1 %vm1287_vm2, %v2111_v33 }
 0x8fc   : > { %7006 = vmatpush3.bf16.msra.mxu1 %v7711_v23  ;;  %6639 = vmatprep.mubr.msk.f32.mxu1 %vm604_vm1, %v7530_v57  ;;  %v7743_v57 = vld [vmem:[%s557_s24 + $0x8] sm:$0xff]  ;;  %s564_s24 = scalar_lea.vmem %s8127_s4, %s6062_s27 }
 0x8fd   : > { %7008 = vmatprep.subr.bf16.mxu1 %v7720_v34 }
 0x900   : > { %7010 = vmatpush3.bf16.msra.mxu1 %v7720_v34 }
 0x901   : > { %7012 = vmatprep.subr.bf16.mxu1 %v7505_v50 }
 0x903   : > { %6640 = vmatmul.mubr.msk.f32.vlgmr.msra.gmra.mrb[22].mxu1 %vm604_vm1, %v7544_v59 }
 0x904   : > { %7014 = vmatpush3.bf16.msra.mxu1 %v7505_v50  ;;  %6665 = vmatprep.mubr.msk.f32.mxu1 %vm604_vm1, %v7734_v35 }
 0x905   : > { %7016 = vmatprep.subr.bf16.mxu1 %v7528_v56 }
 0x908   : > { %7018 = vmatpush3.bf16.msra.mxu1 %v7528_v56 }
 0x909   : > { %6673 = vmatprep.subr.mxu1 %v7595_v13 }
 0x90b   : > { %6666 = vmatmul.mubr.msk.f32.vlgmr.msra.gmra.mrb[24].mxu1 %vm604_vm1, %v7743_v57 }
 0x90c   : > { %6674 = vmatpush3.msra.mxu1 %v7595_v13 }
 0x90d   : > { %6689 = vmatprep.subr.msk.mxu1 %vm1287_vm2, %v7587_v7 }
 0x9ce   : > { %v6625_v59 = vpop.f32.mrb[20].mxu1 }
 0x9cf   : > { %v2184_v36 = vpop.f32.mrb[21].mxu1 }
 0x9d0   : > { %6628 = vmatprep.mubr.msk.f32.mxu0 %vm1287_vm2, %v2184_v36 }
 0x9d1   : > { %6629 = vmatmul.mubr.msk.f32.vlgmr.msra.gmra.mrb[12].mxu0 %vm1287_vm2, %v6625_v59 }
 0x9d2   : > { %6643 = vmatpush3.xpose.msk.msra.mxu0 %vm1287_vm2, %v7593_v12 }
 0x9d3   : > { %6647 = vmatprep.subr.mxu0 %v7602_v20 }
 0x9d6   : > { %v6641_v37 = vpop.f32.mrb[22].mxu1 }
 0x9d7   : > { %v2349_v8 = vpop.f32.mrb[23].mxu1 }
 0x9d8   : > { %6644 = vmatprep.mubr.msk.f32.mxu0 %vm1287_vm2, %v2349_v8 }
 0x9d9   : > { %6645 = vmatmul.mubr.msk.f32.vlgmr.msra.gmra.mrb[16].mxu0 %vm1287_vm2, %v6641_v37 }
 0x9da   : > { %6648 = vmatpush3.msra.mxu0 %v7602_v20 }
 0x9db   : > { %6652 = vmatprep.subr.mxu0 %v7770_v10 }
 0x9de   : > { %v6667_v22 = vpop.f32.mrb[24].mxu1 }
 0x9df   : > { %v2718_v24 = vpop.f32.mrb[25].mxu1 }
 0xaac   : > { %v6646_v39 = vpop.f32.mrb[16].mxu0 }
 0xaad   : > { %v2443_v40 = vmul.f32 0.35355338, %v6646_v39  ;;  %v2433_v41 = vpop.f32.mrb[17].mxu0 }
 0xaae   : > { %v2442_v42 = vmul.f32 0.35355338, %v2433_v41 }
 0xaaf   : > { %v2445_v47 = vsel %vm1380_vm4, %v2443_v40, -1e+09 }
 0xab0   : > { %v2449_v48 = vsel %vm1287_vm2, %v2445_v47, -inf  ;;  %v2444_v49 = vsel %vm1380_vm4, %v2442_v42, -1e+09 }
 0xab1   : > { %2450 = vmax.xlane.f32.xlu1 %v2449_v48  ;;  %v2446_v51 = vsel %vm1287_vm2, %v2444_v49, -inf }
 0xab2   : > { %2447 = vmax.xlane.f32.xlu0 %v2446_v51 }
 0xb3e   : > { %v2451_v52 = vpop.xlane.xlu1 %2450 }
 0xb3f   : > { %v2453_v53 = vsub.f32 %v2445_v47, %v2451_v52  ;;  %v2448_v54 = vpop.xlane.xlu0 %2447 }
 0xb40   : > { %v2452_v55 = vsub.f32 %v2444_v49, %v2448_v54 }
 0xb41   : > { %v2456_v58 = vmul.f32 1.442695, %v2453_v53 }
 0xb42   : > { %v2454_v60 = vmul.f32 1.442695, %v2452_v55 }
 0xb43   : > { %7167 = vpow2.f32 %v2456_v58 }
 0xb44   : > { %7169 = vpow2.f32 %v2454_v60 }
 0xb4d   : > { %v7168_v61 = vpop.eup %7167 }
 0xb4e   : > { %v7170_v63 = vpop.eup %7169  ;;  %v2461_v0 = vsel %vm1287_vm2, %v7168_v61, 0.0 }
 0xb4f   : > { %2462 = vadd.xlane.f32.xlu1 %v2461_v0  ;;  %v2458_v5 = vsel %vm1287_vm2, %v7170_v63, 0.0 }
 0xb50   : > { %2459 = vadd.xlane.f32.xlu0 %v2458_v5 }
 0xbdc   : > { %v2463_v11 = vpop.xlane.xlu1 %2462 }
 0xbdd   : > { %7171 = vrcp.f32 %v2463_v11  ;;  %v2460_v14 = vpop.xlane.xlu0 %2459 }
 0xbde   : > { %7173 = vrcp.f32 %v2460_v14 }
 0xbe7   : > { %v7172_v15 = vpop.eup %7171 }
 0xbe8   : > { %v7174_v18 = vpop.eup %7173  ;;  %v2467_v21 = vmul.f32 %v7172_v15, %v7168_v61 }
 0xbe9   : > { %v2466_v19 = vmul.f32 %v7174_v18, %v7170_v63 }
 0xbeb   : > { %6649 = vmatprep.mubr.msk.f32.mxu0 %vm1287_vm2, %v2466_v19 }
 0xbec   : > { %6650 = vmatmul.mubr.msk.f32.vlgmr.msra.gmra.mrb[18].mxu0 %vm1287_vm2, %v2467_v21 }
 0xbed   : > { %6653 = vmatpush3.msra.mxu0 %v7770_v10 }
 0xbee   : > { %6668 = vmatprep.subr.msk.mxu0 %vm1287_vm2, %v7581_v4 }
 0xcbf   : > { %v6651_v25 = vpop.f32.mrb[18].mxu0 }
 0xcc0   : > { %v2540_v26 = vpop.f32.mrb[19].mxu0 }
 0xcc1   : > { %6654 = vmatprep.mubr.msk.f32.mxu0 %vm1287_vm2, %v2540_v26 }
 0xcc2   : > { %6655 = vmatmul.mubr.msk.f32.vlgmr.msra.gmra.mrb[12].mxu0 %vm1287_vm2, %v6651_v25 }
 0xcc3   : > { %6669 = vmatpush3.xpose.msk.msra.mxu0 %vm1287_vm2, %v7581_v4  ;;  %6670 = vmatprep.mubr.msk.f32.mxu0 %vm1287_vm2, %v2718_v24 }
 0xcc4   : > { %7020 = vmatprep.subr.bf16.mxu0 %v7558_v62 }
 0xcc6   : > { %6671 = vmatmul.mubr.msk.f32.vlgmr.msra.gmra.mrb[20].mxu0 %vm1287_vm2, %v6667_v22 }
 0xcc7   : > { %7022 = vmatpush3.bf16.msra.mxu0 %v7558_v62  ;;  %6686 = vmatprep.mubr.msk.f32.mxu0 %vm604_vm1, %v7734_v35 }
 0xcc8   : > { %7024 = vmatprep.subr.bf16.mxu0 %v7568_v1 }
 0xccb   : > { %7026 = vmatpush3.bf16.msra.mxu0 %v7568_v1 }
 0xccc   : > { %6699 = vmatprep.subr.mxu0 %v7648_v30 }
 0xcce   : > { %6687 = vmatmul.mubr.msk.f32.vlgmr.msra.gmra.mrb[22].mxu0 %vm604_vm1, %v7743_v57 }
 0xccf   : > { %6700 = vmatpush3.msra.mxu0 %v7648_v30 }
 0xcd0   : > { %6704 = vmatprep.subr.mxu0 %v7575_v2 }
 0xd95   : > { %v6656_v27 = vpop.f32.mrb[12].mxu0 }
 0xd96   : > { %v7796_v28 = vadd.f32 %v6656_v27, %v7688_v45  ;;  %v2623_v31 = vpop.f32.mrb[13].mxu0 }
 0xd97   : > { %v7799_v32 = vadd.f32 %v2623_v31, %v7690_v46 }
 0xd99   : > { %v6672_v33 = vpop.f32.mrb[20].mxu0 }
 0xd9a   : > { %v2809_v59 = vmul.f32 0.35355338, %v6672_v33  ;;  %v2799_v36 = vpop.f32.mrb[21].mxu0 }
 0xd9b   : > { %v2808_v37 = vmul.f32 0.35355338, %v2799_v36 }
 0xd9c   : > { %v2811_v8 = vsel %vm1380_vm4, %v2809_v59, -1e+09 }
 0xd9d   : > { %v2815_v39 = vsel %vm1287_vm2, %v2811_v8, -inf  ;;  %v2810_v40 = vsel %vm1380_vm4, %v2808_v37, -1e+09 }
 0xd9e   : > { %2816 = vmax.xlane.f32.xlu1 %v2815_v39  ;;  %v2812_v45 = vsel %vm1287_vm2, %v2810_v40, -inf }
 0xd9f   : > { %2813 = vmax.xlane.f32.xlu0 %v2812_v45 }
 0xda1   : > { %v6688_v55 = vpop.f32.mrb[22].mxu0 }
 0xda2   : > { %v2981_v58 = vpop.f32.mrb[23].mxu0 }
 0xe2b   : > { %v2817_v41 = vpop.xlane.xlu1 %2816 }
 0xe2c   : > { %v2819_v42 = vsub.f32 %v2811_v8, %v2817_v41  ;;  %v2814_v46 = vpop.xlane.xlu0 %2813 }
 0xe2d   : > { %v2818_v47 = vsub.f32 %v2810_v40, %v2814_v46 }
 0xe2e   : > { %v2822_v48 = vmul.f32 1.442695, %v2819_v42 }
 0xe2f   : > { %v2820_v49 = vmul.f32 1.442695, %v2818_v47 }
 0xe30   : > { %7175 = vpow2.f32 %v2822_v48 }
 0xe31   : > { %7177 = vpow2.f32 %v2820_v49 }
 0xe3a   : > { %v7176_v51 = vpop.eup %7175 }
 0xe3b   : > { %v7178_v52 = vpop.eup %7177  ;;  %v2827_v53 = vsel %vm1287_vm2, %v7176_v51, 0.0 }
 0xe3c   : > { %2828 = vadd.xlane.f32.xlu1 %v2827_v53  ;;  %v2824_v54 = vsel %vm1287_vm2, %v7178_v52, 0.0 }
 0xe3d   : > { %2825 = vadd.xlane.f32.xlu0 %v2824_v54 }
 0xec9   : > { %v2829_v60 = vpop.xlane.xlu1 %2828 }
 0xeca   : > { %7179 = vrcp.f32 %v2829_v60  ;;  %v2826_v61 = vpop.xlane.xlu0 %2825 }
 0xecb   : > { %7181 = vrcp.f32 %v2826_v61 }
 0xed4   : > { %v7180_v63 = vpop.eup %7179 }
 0xed5   : > { %v7182_v0 = vpop.eup %7181  ;;  %v2833_v11 = vmul.f32 %v7180_v63, %v7176_v51 }
 0xed6   : > { %v2832_v5 = vmul.f32 %v7182_v0, %v7178_v52 }
 0xed8   : > { %6675 = vmatprep.mubr.msk.f32.mxu1 %vm1287_vm2, %v2832_v5 }
 0xed9   : > { %6676 = vmatmul.mubr.msk.f32.vlgmr.msra.gmra.mrb[26].mxu1 %vm1287_vm2, %v2833_v11 }
 0xeda   : > { %6690 = vmatpush3.xpose.msk.msra.mxu1 %vm1287_vm2, %v7587_v7  ;;  %6691 = vmatprep.mubr.msk.f32.mxu1 %vm1287_vm2, %v2981_v58 }
 0xedb   : > { %6694 = vmatprep.subr.mxu1 %v7598_v16 }
 0xedd   : > { %6692 = vmatmul.mubr.msk.f32.vlgmr.msra.gmra.mrb[28].mxu1 %vm1287_vm2, %v6688_v55 }
 0xede   : > { %6695 = vmatpush3.msra.mxu1 %v7598_v16 }
 0xedf   : > { %7028 = vmatprep.subr.bf16.mxu1 %v7660_v38 }
 0xfac   : > { %v6677_v14 = vpop.f32.mrb[26].mxu1 }
 0xfad   : > { %v2906_v15 = vpop.f32.mrb[27].mxu1 }
 0xfb0   : > { %v6693_v18 = vpop.f32.mrb[28].mxu1 }
 0xfb1   : > { %v3072_v19 = vmul.f32 0.35355338, %v6693_v18  ;;  %v3062_v21 = vpop.f32.mrb[29].mxu1 }
 0xfb2   : > { %v3071_v22 = vmul.f32 0.35355338, %v3062_v21 }
 0xfb3   : > { %v3074_v24 = vsel %vm1380_vm4, %v3072_v19, -1e+09 }
 0xfb4   : > { %v3078_v25 = vsel %vm1287_vm2, %v3074_v24, -inf  ;;  %v3073_v26 = vsel %vm1380_vm4, %v3071_v22, -1e+09 }
 0xfb5   : > { %3079 = vmax.xlane.f32.xlu1 %v3078_v25  ;;  %v3075_v27 = vsel %vm1287_vm2, %v3073_v26, -inf }
 0xfb6   : > { %3076 = vmax.xlane.f32.xlu0 %v3075_v27 }
0x1042   : > { %v3080_v31 = vpop.xlane.xlu1 %3079 }
0x1043   : > { %v3082_v33 = vsub.f32 %v3074_v24, %v3080_v31  ;;  %v3077_v59 = vpop.xlane.xlu0 %3076 }
0x1044   : > { %v3081_v36 = vsub.f32 %v3073_v26, %v3077_v59 }
0x1045   : > { %v3085_v37 = vmul.f32 1.442695, %v3082_v33 }
0x1046   : > { %v3083_v8 = vmul.f32 1.442695, %v3081_v36 }
0x1047   : > { %7183 = vpow2.f32 %v3085_v37 }
0x1048   : > { %7185 = vpow2.f32 %v3083_v8 }
0x1051   : > { %v7184_v39 = vpop.eup %7183 }
0x1052   : > { %v7186_v40 = vpop.eup %7185  ;;  %v3090_v45 = vsel %vm1287_vm2, %v7184_v39, 0.0 }
0x1053   : > { %3091 = vadd.xlane.f32.xlu1 %v3090_v45  ;;  %v3087_v41 = vsel %vm1287_vm2, %v7186_v40, 0.0 }
0x1054   : > { %3088 = vadd.xlane.f32.xlu0 %v3087_v41 }
0x10e0   : > { %v3092_v42 = vpop.xlane.xlu1 %3091 }
0x10e1   : > { %7187 = vrcp.f32 %v3092_v42  ;;  %v3089_v46 = vpop.xlane.xlu0 %3088 }
0x10e2   : > { %7189 = vrcp.f32 %v3089_v46 }
0x10eb   : > { %v7188_v47 = vpop.eup %7187 }
0x10ec   : > { %v7190_v48 = vpop.eup %7189  ;;  %v3096_v51 = vmul.f32 %v7188_v47, %v7184_v39 }
0x10ed   : > { %v3095_v49 = vmul.f32 %v7190_v48, %v7186_v40 }
0x10ef   : > { %6696 = vmatprep.mubr.msk.f32.mxu1 %vm1287_vm2, %v3095_v49 }
0x10f0   : > { %6697 = vmatmul.mubr.msk.f32.vlgmr.msra.gmra.mrb[30].mxu1 %vm1287_vm2, %v3096_v51 }
0x10f1   : > { %7030 = vmatpush3.bf16.msra.mxu1 %v7660_v38  ;;  %6717 = vmatprep.mubr.msk.f32.mxu1 %vm604_vm1, %v7734_v35 }
0x10f2   : > { %7032 = vmatprep.subr.bf16.mxu1 %v7669_v43 }
0x10f5   : > { %7034 = vmatpush3.bf16.msra.mxu1 %v7669_v43 }
0x10f6   : > { %6725 = vmatprep.subr.mxu1 %v7600_v17 }
0x10f8   : > { %6718 = vmatmul.mubr.msk.f32.vlgmr.msra.gmra.mrb[32].mxu1 %vm604_vm1, %v7743_v57 }
0x10f9   : > { %6726 = vmatpush3.msra.mxu1 %v7600_v17 }
0x10fa   : > { %7036 = vmatprep.subr.bf16.mxu1 %v7711_v23 }
0x11c3   : > { %v6698_v52 = vpop.f32.mrb[30].mxu1 }
0x11c4   : > { %v3169_v53 = vpop.f32.mrb[31].mxu1 }
0x11c5   : > { %6701 = vmatprep.mubr.msk.f32.mxu0 %vm1287_vm2, %v3169_v53 }
0x11c6   : > { %6702 = vmatmul.mubr.msk.f32.vlgmr.msra.gmra.mrb[24].mxu0 %vm1287_vm2, %v6698_v52 }
0x11c7   : > { %6705 = vmatpush3.msra.mxu0 %v7575_v2  ;;  %6706 = vmatprep.mubr.msk.f32.mxu0 %vm1287_vm2, %v2906_v15 }
0x11c8   : > { %6720 = vmatprep.subr.msk.mxu0 %vm1287_vm2, %v7589_v9 }
0x11cb   : > { %v6719_v54 = vpop.f32.mrb[32].mxu1 }
0x11cc   : > { %v3406_v55 = vpop.f32.mrb[33].mxu1 }
0x11ce   : > { %6707 = vmatmul.mubr.msk.f32.vlgmr.msra.gmra.mrb[24].mxu0 %vm1287_vm2, %v6677_v14 }
0x11cf   : > { %6721 = vmatpush3.xpose.msk.msra.mxu0 %vm1287_vm2, %v7589_v9  ;;  %6722 = vmatprep.mubr.msk.f32.mxu0 %vm1287_vm2, %v3406_v55 }
0x11d0   : > { %6730 = vmatprep.subr.mxu0 %v7685_v44 }
0x11d2   : > { %6723 = vmatmul.mubr.msk.f32.vlgmr.msra.gmra.mrb[26].mxu0 %vm1287_vm2, %v6719_v54 }
0x11d3   : > { %6731 = vmatpush3.msra.mxu0 %v7685_v44 }
0x11d4   : > { %6746 = vmatprep.subr.msk.mxu0 %vm1287_vm2, %v7593_v12 }
0x12a5   : > { %v6724_v2 = vpop.f32.mrb[26].mxu0 }
0x12a6   : > { %v3497_v58 = vmul.f32 0.35355338, %v6724_v2  ;;  %v3487_v60 = vpop.f32.mrb[27].mxu0 }
0x12a7   : > { %v3496_v61 = vmul.f32 0.35355338, %v3487_v60 }
0x12a8   : > { %v3499_v63 = vsel %vm1380_vm4, %v3497_v58, -1e+09 }
0x12a9   : > { %v3503_v0 = vsel %vm1287_vm2, %v3499_v63, -inf  ;;  %v3498_v5 = vsel %vm1380_vm4, %v3496_v61, -1e+09 }
0x12aa   : > { %3504 = vmax.xlane.f32.xlu1 %v3503_v0  ;;  %v3500_v11 = vsel %vm1287_vm2, %v3498_v5, -inf }
0x12ab   : > { %3501 = vmax.xlane.f32.xlu0 %v3500_v11 }
0x1337   : > { %v3505_v14 = vpop.xlane.xlu1 %3504 }
0x1338   : > { %v3507_v15 = vsub.f32 %v3499_v63, %v3505_v14  ;;  %v3502_v18 = vpop.xlane.xlu0 %3501 }
0x1339   : > { %v3506_v19 = vsub.f32 %v3498_v5, %v3502_v18 }
0x133a   : > { %v3510_v21 = vmul.f32 1.442695, %v3507_v15 }
0x133b   : > { %v3508_v22 = vmul.f32 1.442695, %v3506_v19 }
0x133c   : > { %7191 = vpow2.f32 %v3510_v21 }
0x133d   : > { %7193 = vpow2.f32 %v3508_v22 }
0x1346   : > { %v7192_v24 = vpop.eup %7191 }
0x1347   : > { %v7194_v25 = vpop.eup %7193  ;;  %v3515_v26 = vsel %vm1287_vm2, %v7192_v24, 0.0 }
0x1348   : > { %3516 = vadd.xlane.f32.xlu1 %v3515_v26  ;;  %v3512_v27 = vsel %vm1287_vm2, %v7194_v25, 0.0 }
0x1349   : > { %3513 = vadd.xlane.f32.xlu0 %v3512_v27 }
0x13d5   : > { %v3517_v31 = vpop.xlane.xlu1 %3516 }
0x13d6   : > { %7195 = vrcp.f32 %v3517_v31  ;;  %v3514_v33 = vpop.xlane.xlu0 %3513 }
0x13d7   : > { %7197 = vrcp.f32 %v3514_v33 }
0x13e0   : > { %v7196_v59 = vpop.eup %7195 }
0x13e1   : > { %v7198_v36 = vpop.eup %7197  ;;  %v3521_v8 = vmul.f32 %v7196_v59, %v7192_v24 }
0x13e2   : > { %v3520_v37 = vmul.f32 %v7198_v36, %v7194_v25 }
0x13e4   : > { %6727 = vmatprep.mubr.msk.f32.mxu1 %vm1287_vm2, %v3520_v37 }
0x13e5   : > { %6728 = vmatmul.mubr.msk.f32.vlgmr.msra.gmra.mrb[34].mxu1 %vm1287_vm2, %v3521_v8 }
0x13e6   : > { %7038 = vmatpush3.bf16.msra.mxu1 %v7711_v23  ;;  %6743 = vmatprep.mubr.msk.f32.mxu1 %vm604_vm1, %v7734_v35  ;;  %v7878_v35 = vld [vmem:[%s7391_s16] sm:$0xff] }
0x13e7   : > { %7040 = vmatprep.subr.bf16.mxu1 %v7720_v34 }
0x13ea   : > { %7042 = vmatpush3.bf16.msra.mxu1 %v7720_v34 }
0x13eb   : > { %7043 = vmatprep.subr.bf16.mxu1 %v7269_v3 }
0x13ed   : > { %6744 = vmatmul.mubr.msk.f32.vlgmr.msra.gmra.mrb[36].mxu1 %vm604_vm1, %v7743_v57 }
0x13ee   : > { %7045 = vmatpush3.bf16.msra.mxu1 %v7505_v50  ;;  %6769 = vmatprep.mubr.msk.f32.mxu1 %vm7270_vm0, %v7271_v6 }
0x13ef   : > { %7046 = vmatprep.subr.bf16.mxu1 %v7269_v3 }
0x13f2   : > { %7048 = vmatpush3.bf16.msra.mxu1 %v7528_v56 }
0x13f3   : > { %6777 = vmatprep.subr.mxu1 %v7271_v6 }
0x13f5   : > { %6770 = vmatmul.mubr.msk.f32.vlgmr.msra.gmra.mrb[38].mxu1 %vm604_vm1, %v7878_v35 }
0x13f6   : > { %6778 = vmatpush3.msra.mxu1 %v7595_v13  ;;  %6779 = vmatprep.mubr.msk.f32.mxu1 %vm7270_vm0, %v7271_v6 }
0x13f7   : > { %6793 = vmatprep.subr.mxu1 %v7271_v6 }
0x14b8   : > { %v6729_v50 = vpop.f32.mrb[34].mxu1 }
0x14b9   : > { %v3594_v57 = vpop.f32.mrb[35].mxu1 }
0x14ba   : > { %6732 = vmatprep.mubr.msk.f32.mxu0 %vm1287_vm2, %v3594_v57 }
0x14bb   : > { %6733 = vmatmul.mubr.msk.f32.vlgmr.msra.gmra.mrb[24].mxu0 %vm1287_vm2, %v6729_v50 }
0x14bc   : > { %6747 = vmatpush3.xpose.msk.msra.mxu0 %vm1287_vm2, %v7593_v12 }
0x14bd   : > { %6751 = vmatprep.subr.mxu0 %v7602_v20 }
0x14c0   : > { %v6745_v56 = vpop.f32.mrb[36].mxu1 }
0x14c1   : > { %v3752_v39 = vpop.f32.mrb[37].mxu1 }
0x14c2   : > { %6748 = vmatprep.mubr.msk.f32.mxu0 %vm1287_vm2, %v3752_v39 }
0x14c3   : > { %6749 = vmatmul.mubr.msk.f32.vlgmr.msra.gmra.mrb[28].mxu0 %vm1287_vm2, %v6745_v56 }
0x14c4   : > { %6752 = vmatpush3.msra.mxu0 %v7602_v20 }
0x14c5   : > { %6756 = vmatprep.subr.mxu0 %v7770_v10 }
0x14c8   : > { %v4110_v18 = vpop.f32.mrb[38].mxu1 }
0x14c9   : > { %v6771_v19 = vpop.f32.mrb[39].mxu1 }
0x1596   : > { %v6750_v13 = vpop.f32.mrb[28].mxu0 }
0x1597   : > { %v3843_v40 = vmul.f32 0.35355338, %v6750_v13  ;;  %v3833_v45 = vpop.f32.mrb[29].mxu0 }
0x1598   : > { %v3842_v41 = vmul.f32 0.35355338, %v3833_v45 }
0x1599   : > { %v3845_v42 = vsel %vm1380_vm4, %v3843_v40, -1e+09 }
0x159a   : > { %v3849_v46 = vsel %vm1287_vm2, %v3845_v42, -inf  ;;  %v3844_v47 = vsel %vm1380_vm4, %v3842_v41, -1e+09 }
0x159b   : > { %3850 = vmax.xlane.f32.xlu1 %v3849_v46  ;;  %v3846_v48 = vsel %vm1287_vm2, %v3844_v47, -inf }
0x159c   : > { %3847 = vmax.xlane.f32.xlu0 %v3846_v48 }
0x1628   : > { %v3851_v49 = vpop.xlane.xlu1 %3850 }
0x1629   : > { %v3853_v51 = vsub.f32 %v3845_v42, %v3851_v49  ;;  %v3848_v52 = vpop.xlane.xlu0 %3847 }
0x162a   : > { %v3852_v53 = vsub.f32 %v3844_v47, %v3848_v52 }
0x162b   : > { %v3856_v54 = vmul.f32 1.442695, %v3853_v51 }
0x162c   : > { %v3854_v55 = vmul.f32 1.442695, %v3852_v53 }
0x162d   : > { %7199 = vpow2.f32 %v3856_v54 }
0x162e   : > { %7201 = vpow2.f32 %v3854_v55 }
0x1637   : > { %v7200_v2 = vpop.eup %7199 }
0x1638   : > { %v7202_v58 = vpop.eup %7201  ;;  %v3861_v60 = vsel %vm1287_vm2, %v7200_v2, 0.0 }
0x1639   : > { %3862 = vadd.xlane.f32.xlu1 %v3861_v60  ;;  %v3858_v61 = vsel %vm1287_vm2, %v7202_v58, 0.0 }
0x163a   : > { %3859 = vadd.xlane.f32.xlu0 %v3858_v61 }
0x16c6   : > { %v3863_v63 = vpop.xlane.xlu1 %3862 }
0x16c7   : > { %7203 = vrcp.f32 %v3863_v63  ;;  %v3860_v0 = vpop.xlane.xlu0 %3859 }
0x16c8   : > { %7205 = vrcp.f32 %v3860_v0 }
0x16d1   : > { %v7204_v5 = vpop.eup %7203 }
0x16d2   : > { %v7206_v11 = vpop.eup %7205  ;;  %v3867_v15 = vmul.f32 %v7204_v5, %v7200_v2 }
0x16d3   : > { %v3866_v14 = vmul.f32 %v7206_v11, %v7202_v58 }
0x16d5   : > { %6753 = vmatprep.mubr.msk.f32.mxu0 %vm1287_vm2, %v3866_v14 }
0x16d6   : > { %6754 = vmatmul.mubr.msk.f32.vlgmr.msra.gmra.mrb[30].mxu0 %vm1287_vm2, %v3867_v15 }
0x16d7   : > { %6757 = vmatpush3.msra.mxu0 %v7770_v10 }
0x16d8   : > { %6772 = vmatprep.subr.mxu0 %v7271_v6 }
0x17a9   : > { %v6755_v21 = vpop.f32.mrb[30].mxu0 }
0x17aa   : > { %v3940_v22 = vpop.f32.mrb[31].mxu0 }
0x17ab   : > { %6758 = vmatprep.mubr.msk.f32.mxu0 %vm1287_vm2, %v3940_v22 }
0x17ac   : > { %6759 = vmatmul.mubr.msk.f32.vlgmr.msra.gmra.mrb[24].mxu0 %vm1287_vm2, %v6755_v21 }
0x17ad   : > { %6773 = vmatpush3.xpose.msk.msra.mxu0 %vm1287_vm2, %v7581_v4  ;;  %6774 = vmatprep.mubr.msk.f32.mxu0 %vm7270_vm0, %v7271_v6 }
0x17ae   : > { %7049 = vmatprep.subr.bf16.mxu0 %v7269_v3 }
0x17b0   : > { %6775 = vmatmul.mubr.msk.f32.vlgmr.msra.gmra.mrb[32].mxu0 %vm1287_vm2, %v4110_v18 }
0x17b1   : > { %7051 = vmatpush3.bf16.msra.mxu0 %v7558_v62  ;;  %6790 = vmatprep.mubr.msk.f32.mxu0 %vm7270_vm0, %v7271_v6 }
0x17b2   : > { %7052 = vmatprep.subr.bf16.mxu0 %v7269_v3 }
0x17b5   : > { %7054 = vmatpush3.bf16.msra.mxu0 %v7568_v1 }
0x17b6   : > { %6803 = vmatprep.subr.mxu0 %v7271_v6 }
0x17b8   : > { %6791 = vmatmul.mubr.msk.f32.vlgmr.msra.gmra.mrb[34].mxu0 %vm604_vm1, %v7878_v35 }
0x17b9   : > { %6804 = vmatpush3.msra.mxu0 %v7648_v30  ;;  %6805 = vmatprep.mubr.msk.f32.mxu0 %vm7270_vm0, %v7271_v6 }
0x17ba   : > { %6808 = vmatprep.subr.mxu0 %v7271_v6 }
0x187f   : > { %v7927_v62 = vpop.f32.mrb[24].mxu0 }
0x1880   : > { %v7929_v4 = vpop.f32.mrb[25].mxu0 }
0x1883   : > { %v4183_v24 = vpop.f32.mrb[32].mxu0 }
0x1884   : > { %v4187_v25 = vmul.f32 0.35355338, %v4183_v24  ;;  %v6776_v26 = vpop.f32.mrb[33].mxu0 }
0x1885   : > { %v588_v26 = vld [vmem:[%s569_s19] sm:$0xff] }
0x1886   : > { %v4188_v1 = vsel %vm1380_vm4, %v4187_v25, -1e+09 }
0x1887   : > { %v4189_v27 = vsel %vm1287_vm2, %v4188_v1, -inf }
0x1888   : > { %4190 = vmax.xlane.f32.xlu0 %v4189_v27 }
0x188b   : > { %v4339_v37 = vpop.f32.mrb[34].mxu0 }
0x188c   : > { %v6792_v8 = vpop.f32.mrb[35].mxu0 }
0x188d   : > { %v589_v8 = vld [vmem:[%s569_s19 + $0x8] sm:$0xff] }
0x1915   : > { %v4191_v31 = vpop.xlane.xlu0 %4190 }
0x1916   : > { %v4192_v30 = vsub.f32 %v4188_v1, %v4191_v31  ;;  %v593_v1 = vld [vmem:[%s8134_s11 + $0x8] sm:$0xff] }
0x1918   : > { %v4193_v33 = vmul.f32 1.442695, %v4192_v30 }
0x191a   : > { %7207 = vpow2.f32 %v4193_v33 }
0x1924   : > { %v7208_v59 = vpop.eup %7207 }
0x1925   : > { %v4195_v36 = vsel %vm1287_vm2, %v7208_v59, 0.0 }
0x1926   : > { %4196 = vadd.xlane.f32.xlu1 %v4195_v36 }
0x19b3   : > { %v4197_v50 = vpop.xlane.xlu1 %4196 }
0x19b4   : > { %7209 = vrcp.f32 %v4197_v50  ;;  %v594_v50 = vld [vmem:[%s8134_s11 + $0x10] sm:$0xff] }
0x19be   : > { %v7210_v57 = vpop.eup %7209 }
0x19bf   : > { %v4199_v56 = vmul.f32 %v7210_v57, %v7208_v59  ;;  %v595_v57 = vld [vmem:[%s8134_s11 + $0x18] sm:$0xff] }
0x19c1   : > { %6780 = vmatmul.mubr.msk.f32.vlgmr.msra.gmra.mrb[40].mxu1 %vm1287_vm2, %v4199_v56  ;;  %v590_v56 = vld [vmem:[%s574_s18] sm:$0xff] }
0x19c2   : > { %6794 = vmatpush3.xpose.msk.msra.mxu1 %vm1287_vm2, %v7587_v7  ;;  %6795 = vmatprep.mubr.msk.f32.mxu1 %vm7270_vm0, %v7271_v6 }
0x19c3   : > { %6798 = vmatprep.subr.mxu1 %v7271_v6 }
0x19c5   : > { %6796 = vmatmul.mubr.msk.f32.vlgmr.msra.gmra.mrb[42].mxu1 %vm1287_vm2, %v4339_v37 }
0x19c6   : > { %6799 = vmatpush3.msra.mxu1 %v7598_v16  ;;  %6800 = vmatprep.mubr.msk.f32.mxu1 %vm7270_vm0, %v7271_v6 }
0x19c7   : > { %7055 = vmatprep.subr.bf16.mxu1 %v7269_v3 }
0x1a94   : > { %v4269_v39 = vpop.f32.mrb[40].mxu1 }
0x1a95   : > { %v6781_v13 = vpop.f32.mrb[41].mxu1 }
0x1a98   : > { %v4412_v40 = vpop.f32.mrb[42].mxu1 }
0x1a99   : > { %v4416_v45 = vmul.f32 0.35355338, %v4412_v40  ;;  %v6797_v41 = vpop.f32.mrb[43].mxu1 }
0x1a9b   : > { %v4417_v7 = vsel %vm1380_vm4, %v4416_v45, -1e+09 }
0x1a9c   : > { %v4418_v42 = vsel %vm1287_vm2, %v4417_v7, -inf }
0x1a9d   : > { %4419 = vmax.xlane.f32.xlu0 %v4418_v42 }
0x1b2a   : > { %v4420_v46 = vpop.xlane.xlu0 %4419 }
0x1b2b   : > { %v4421_v47 = vsub.f32 %v4417_v7, %v4420_v46 }
0x1b2d   : > { %v4422_v48 = vmul.f32 1.442695, %v4421_v47 }
0x1b2f   : > { %7211 = vpow2.f32 %v4422_v48 }
0x1b39   : > { %v7212_v16 = vpop.eup %7211 }
0x1b3a   : > { %v4424_v49 = vsel %vm1287_vm2, %v7212_v16, 0.0 }
0x1b3b   : > { %4425 = vadd.xlane.f32.xlu1 %v4424_v49 }
0x1bc8   : > { %v4426_v51 = vpop.xlane.xlu1 %4425 }
0x1bc9   : > { %7213 = vrcp.f32 %v4426_v51  ;;  %v598_v51 = vld [vmem:[%s8135_s12 + $0x10] sm:$0xff] }
0x1bd3   : > { %v7214_v52 = vpop.eup %7213 }
0x1bd4   : > { %v4428_v53 = vmul.f32 %v7214_v52, %v7212_v16  ;;  %v599_v52 = vld [vmem:[%s8135_s12 + $0x18] sm:$0xff] }
0x1bd6   : > { %6801 = vmatmul.mubr.msk.f32.vlgmr.msra.gmra.mrb[44].mxu1 %vm1287_vm2, %v4428_v53  ;;  %v7079_v53 = vpack.c.bf16 %v599_v52, %v598_v51 }
0x1bd7   : > { %7057 = vmatpush3.bf16.msra.mxu1 %v7660_v38  ;;  %6821 = vmatprep.mubr.msk.f32.mxu1 %vm7270_vm0, %v7271_v6 }
0x1bd8   : > { %7058 = vmatprep.subr.bf16.mxu1 %v7269_v3 }
0x1bdb   : > { %7060 = vmatpush3.bf16.msra.mxu1 %v7669_v43  ;;  %v7260_v43 = vld [vmem:[%s8133_s10] sm:$0xff] }
0x1bdc   : > { %6829 = vmatprep.subr.mxu1 %v7271_v6 }
0x1bde   : > { %6822 = vmatmul.mubr.msk.f32.vlgmr.msra.gmra.mrb[46].mxu1 %vm604_vm1, %v7878_v35 }
0x1bdf   : > { %6830 = vmatpush3.msra.mxu1 %v7600_v17  ;;  %6831 = vmatprep.mubr.msk.f32.mxu1 %vm7270_vm0, %v7271_v6 }
0x1be0   : > { %7061 = vmatprep.subr.bf16.mxu1 %v7269_v3 }
0x1ca9   : > { %v4498_v38 = vpop.f32.mrb[44].mxu1 }
0x1caa   : > { %v6802_v54 = vpop.f32.mrb[45].mxu1  ;;  %6806 = vmatmul.mubr.msk.f32.vlgmr.msra.gmra.mrb[36].mxu0 %vm1287_vm2, %v4498_v38 }
0x1cab   : > { %6809 = vmatpush3.msra.mxu0 %v7260_v43  ;;  %6810 = vmatprep.mubr.msk.f32.mxu0 %vm7270_vm0, %v7271_v6 }
0x1cac   : > { %6824 = vmatprep.subr.mxu0 %v7271_v6 }
0x1cb1   : > { %v4714_v17 = vpop.f32.mrb[46].mxu1 }
0x1cb2   : > { %6811 = vmatmul.mubr.msk.f32.vlgmr.msra.gmra.mrb[36].mxu0 %vm1287_vm2, %v4269_v39  ;;  %v6823_v55 = vpop.f32.mrb[47].mxu1  ;;  %v591_v39 = vld [vmem:[%s574_s18 + $0x8] sm:$0xff]  ;;  %s577_s18 = scalar_lea.vmem %s8136_s13, %s8139_s30 }
0x1cb3   : > { %6825 = vmatpush3.xpose.msk.msra.mxu0 %vm1287_vm2, %v7589_v9  ;;  %6826 = vmatprep.mubr.msk.f32.mxu0 %vm7270_vm0, %v7271_v6 }
0x1cb4   : > { %6834 = vmatprep.subr.mxu0 %v7271_v6 }
0x1cb6   : > { %6827 = vmatmul.mubr.msk.f32.vlgmr.msra.gmra.mrb[38].mxu0 %vm1287_vm2, %v4714_v17 }
0x1cb7   : > { %6835 = vmatpush3.msra.mxu0 %v7685_v44  ;;  %6836 = vmatprep.mubr.msk.f32.mxu0 %vm7270_vm0, %v7271_v6 }
0x1cb8   : > { %6850 = vmatprep.subr.mxu0 %v7271_v6 }
0x1d89   : > { %v4787_v2 = vpop.f32.mrb[38].mxu0 }
0x1d8a   : > { %v4791_v58 = vmul.f32 0.35355338, %v4787_v2  ;;  %v6828_v60 = vpop.f32.mrb[39].mxu0 }
0x1d8c   : > { %v4792_v9 = vsel %vm1380_vm4, %v4791_v58, -1e+09 }
0x1d8d   : > { %v4793_v61 = vsel %vm1287_vm2, %v4792_v9, -inf }
0x1d8e   : > { %4794 = vmax.xlane.f32.xlu0 %v4793_v61 }
0x1e1b   : > { %v4795_v63 = vpop.xlane.xlu0 %4794 }
0x1e1c   : > { %v4796_v0 = vsub.f32 %v4792_v9, %v4795_v63 }
0x1e1e   : > { %v4797_v5 = vmul.f32 1.442695, %v4796_v0 }
0x1e20   : > { %7215 = vpow2.f32 %v4797_v5 }
0x1e2a   : > { %v7216_v11 = vpop.eup %7215 }
0x1e2b   : > { %v4799_v44 = vsel %vm1287_vm2, %v7216_v11, 0.0 }
0x1e2c   : > { %4800 = vadd.xlane.f32.xlu1 %v4799_v44 }
0x1eb9   : > { %v4801_v14 = vpop.xlane.xlu1 %4800 }
0x1eba   : > { %7217 = vrcp.f32 %v4801_v14 }
0x1ec4   : > { %v7218_v15 = vpop.eup %7217 }
0x1ec5   : > { %v4803_v18 = vmul.f32 %v7218_v15, %v7216_v11 }
0x1ec7   : > { %6832 = vmatmul.mubr.msk.f32.vlgmr.msra.gmra.mrb[48].mxu1 %vm1287_vm2, %v4803_v18 }
0x1ec8   : > { %7063 = vmatpush3.bf16.msra.mxu1 %v7711_v23  ;;  %6847 = vmatprep.mubr.msk.f32.mxu1 %vm7270_vm0, %v7271_v6 }
0x1ec9   : > { %7064 = vmatprep.subr.bf16.mxu1 %v7269_v3 }
0x1ecc   : > { %7066 = vmatpush3.bf16.msra.mxu1 %v7720_v34 }
0x1ecf   : > { %6848 = vmatmul.mubr.msk.f32.vlgmr.msra.gmra.mrb[50].mxu1 %vm604_vm1, %v7878_v35 }
0x1f9a   : > { %v4873_v19 = vpop.f32.mrb[48].mxu1 }
0x1f9b   : > { %v6833_v21 = vpop.f32.mrb[49].mxu1  ;;  %6837 = vmatmul.mubr.msk.f32.vlgmr.msra.gmra.mrb[36].mxu0 %vm1287_vm2, %v4873_v19 }
0x1f9c   : > { %6851 = vmatpush3.xpose.msk.msra.mxu0 %vm1287_vm2, %v7593_v12  ;;  %6852 = vmatprep.mubr.msk.f32.mxu0 %vm7270_vm0, %v7271_v6 }
0x1f9d   : > { %6855 = vmatprep.subr.mxu0 %v7271_v6 }
0x1fa2   : > { %v5017_v23 = vpop.f32.mrb[50].mxu1 }
0x1fa3   : > { %v6849_v22 = vpop.f32.mrb[51].mxu1  ;;  %6853 = vmatmul.mubr.msk.f32.vlgmr.msra.gmra.mrb[40].mxu0 %vm1287_vm2, %v5017_v23 }
0x1fa4   : > { %6856 = vmatpush3.msra.mxu0 %v7602_v20  ;;  %6857 = vmatprep.mubr.msk.f32.mxu0 %vm7270_vm0, %v7271_v6  ;;  %v592_v20 = vld [vmem:[%s8134_s11] sm:$0xff] }
0x1fa5   : > { %6860 = vmatprep.subr.mxu0 %v7271_v6  ;;  %v7067_v27 = vpack.c.bf16 %v593_v1, %v592_v20 }
0x1fa7   : > { %7068 = vmatprep.subr.bf16.mxu1 %v7067_v27 }
0x1fa8   : > { %7070 = vmatpush3.bf16.msra.mxu1 %v7067_v27 }
0x2076   : > { %v5090_v34 = vpop.f32.mrb[40].mxu0 }
0x2077   : > { %v5094_v35 = vmul.f32 0.35355338, %v5090_v34  ;;  %v6854_v24 = vpop.f32.mrb[41].mxu0 }
0x2079   : > { %v5095_v12 = vsel %vm1380_vm4, %v5094_v35, -1e+09 }
0x207a   : > { %v5096_v25 = vsel %vm1287_vm2, %v5095_v12, -inf }
0x207b   : > { %5097 = vmax.xlane.f32.xlu0 %v5096_v25 }
0x2091   : > { %2636 = vperm.xlu0 %7141, %v588_v26  }
0x2108   : > { %v5098_v29 = vpop.xlane.xlu0 %5097 }
0x2109   : > { %v5099_v31 = vsub.f32 %v5095_v12, %v5098_v29 }
0x210b   : > { %v5100_v30 = vmul.f32 1.442695, %v5099_v31 }
0x210d   : > { %7219 = vpow2.f32 %v5100_v30 }
0x2110   : > { %v2637_v33 = vpop.permute.xlu0 %2636 }
0x2111   : > { %v8018_v59 = vmul.f32 %v7799_v32, %v2637_v33  ;;  %v7071_v32 = vpack.c.bf16 %v595_v57, %v594_v50 }
0x2113   : > { %6873 = vmatprep.mubr.msk.f32.mxu1 %vm604_vm1, %v8018_v59  ;;  %7072 = vmatprep.subr.bf16.mxu1 %v7071_v32 }
0x2114   : > { %7074 = vmatpush3.bf16.msra.mxu1 %v7071_v32 }
0x2115   : > { %7084 = vmatprep.subr.bf16.mxu1 %v7067_v27 }
0x2117   : > { %v7220_v36 = vpop.eup %7219 }
0x2118   : > { %v5102_v37 = vsel %vm1287_vm2, %v7220_v36, 0.0 }
0x2119   : > { %5103 = vadd.xlane.f32.xlu1 %v5102_v37 }
0x212a   : > { %2641 = vperm.xlu1 %7142, %v589_v8  }
0x212e   : > { %4034 = vperm.xlu1 %7142, %v590_v56  }
0x2132   : > { %4039 = vperm.xlu1 %7142, %v591_v39  }
0x21a6   : > { %v5104_v13 = vpop.xlane.xlu1 %5103 }
0x21a7   : > { %7221 = vrcp.f32 %v5104_v13 }
0x21aa   : > { %v2642_v40 = vpop.permute.xlu1 %2641 }
0x21ab   : > { %v8034_v45 = vmul.f32 %v7796_v28, %v2642_v40 }
0x21ad   : > { %6874 = vmatmul.mubr.msk.f32.vlgmr.msra.gmra.mrb[52].mxu1 %vm604_vm1, %v8034_v45 }
0x21ae   : > { %v4035_v41 = vpop.permute.xlu1 %4034  ;;  %7086 = vmatpush3.bf16.msra.mxu1 %v7067_v27 }
0x21af   : > { %v8039_v7 = vmul.f32 %v4035_v41, %v7929_v4  ;;  %7088 = vmatprep.subr.bf16.mxu1 %v7071_v32  ;;  %v597_v4 = vld [vmem:[%s8135_s12 + $0x8] sm:$0xff] }
0x21b1   : > { %v7222_v42 = vpop.eup %7221  ;;  %6895 = vmatprep.mubr.msk.f32.mxu1 %vm604_vm1, %v8039_v7 }
0x21b2   : > { %v5106_v46 = vmul.f32 %v7222_v42, %v7220_v36  ;;  %v4040_v47 = vpop.permute.xlu1 %4039  ;;  %7090 = vmatpush3.bf16.msra.mxu1 %v7071_v32 }
0x21b3   : > { %v8044_v28 = vmul.f32 %v7927_v62, %v4040_v47  ;;  %7099 = vmatprep.subr.bf16.mxu1 %v7269_v3  ;;  %v596_v62 = vld [vmem:[%s8135_s12] sm:$0xff] }
0x21b4   : > { %6858 = vmatmul.mubr.msk.f32.vlgmr.msra.gmra.mrb[42].mxu0 %vm1287_vm2, %v5106_v46  ;;  %v7075_v48 = vpack.c.bf16 %v597_v4, %v596_v62 }
0x21b5   : > { %6896 = vmatmul.mubr.msk.f32.vlgmr.msra.gmra.mrb[54].mxu1 %vm604_vm1, %v8044_v28  ;;  %6861 = vmatpush3.msra.mxu0 %v7770_v10  ;;  %v587_v10 = vld [vmem:[%s564_s24] sm:$0xff] }
0x21b6   : > { %6862 = vmatprep.mubr.msk.f32.mxu0 %vm7270_vm0, %v7271_v6  ;;  %7101 = vmatpush3.bf16.msra.mxu1 %v7067_v27 }
0x21b7   : > { %7102 = vmatprep.subr.bf16.mxu1 %v7269_v3  ;;  %6917 = vmatprep.mubr.msk.f32.mxu1 %vm7270_vm0, %v7271_v6 }
0x21b8   : > { %7076 = vmatprep.subr.bf16.mxu0 %v7075_v48  ;;  %5256 = vperm.xlu1 %7142, %v587_v10  }
0x21ba   : > { %7104 = vmatpush3.bf16.msra.mxu1 %v7071_v32 }
0x2237   : > { %v5257_v9 = vpop.permute.xlu1 %5256 }
0x2280   : > { %v6875_v16 = vpop.f32.mrb[52].mxu1 }
0x2281   : > { %v5332_v49 = vpop.f32.mrb[53].mxu1 }
0x2282   : > { %7223 = vtanh.f32 %v5332_v49 }
0x2283   : > { %7225 = vtanh.f32 %v6875_v16 }
0x2287   : > { %v5176_v38 = vpop.f32.mrb[42].mxu0 }
0x2288   : > { %v6859_v54 = vpop.f32.mrb[43].mxu0  ;;  %6863 = vmatmul.mubr.msk.f32.vlgmr.msra.gmra.mrb[36].mxu0 %vm1287_vm2, %v5176_v38  ;;  %v6897_v43 = vpop.f32.mrb[54].mxu1 }
0x2289   : > { %7078 = vmatpush3.bf16.msra.mxu0 %v7075_v48  ;;  %v5545_v17 = vpop.f32.mrb[55].mxu1 }
0x228a   : > { %7227 = vtanh.f32 %v5545_v17  ;;  %7080 = vmatprep.subr.bf16.mxu0 %v7079_v53 }
0x228b   : > { %7229 = vtanh.f32 %v6897_v43 }
0x228c   : > { %v7224_v55 = vpop.eup %7223 }
0x228d   : > { %7082 = vmatpush3.bf16.msra.mxu0 %v7079_v53  ;;  %6884 = vmatprep.mubr.msk.f32.mxu0 %vm604_vm1, %v7224_v55  ;;  %v7226_v2 = vpop.eup %7225 }
0x228e   : > { %7092 = vmatprep.subr.bf16.mxu0 %v7075_v48 }
0x2290   : > { %6885 = vmatmul.mubr.msk.f32.vlgmr.msra.gmra.mrb[44].mxu0 %vm604_vm1, %v7226_v2 }
0x2291   : > { %7094 = vmatpush3.bf16.msra.mxu0 %v7075_v48 }
0x2292   : > { %7096 = vmatprep.subr.bf16.mxu0 %v7079_v53 }
0x2294   : > { %v7228_v58 = vpop.eup %7227 }
0x2295   : > { %7098 = vmatpush3.bf16.msra.mxu0 %v7079_v53  ;;  %6906 = vmatprep.mubr.msk.f32.mxu0 %vm604_vm1, %v7228_v58  ;;  %v7230_v60 = vpop.eup %7229 }
0x2296   : > { %7105 = vmatprep.subr.bf16.mxu0 %v7269_v3 }
0x2298   : > { %6907 = vmatmul.mubr.msk.f32.vlgmr.msra.gmra.mrb[46].mxu0 %vm604_vm1, %v7230_v60 }
0x2299   : > { %7107 = vmatpush3.bf16.msra.mxu0 %v7075_v48  ;;  %6928 = vmatprep.mubr.msk.f32.mxu0 %vm7270_vm0, %v7271_v6 }
0x229a   : > { %7108 = vmatprep.subr.bf16.mxu0 %v7269_v3 }
0x229d   : > { %7110 = vmatpush3.bf16.msra.mxu0 %v7079_v53 }
0x235b   : > { %v5249_v61 = vpop.f32.mrb[36].mxu0 }
0x235c   : > { %v8082_v63 = vmul.f32 %v5257_v9, %v5249_v61  ;;  %v6864_v0 = vpop.f32.mrb[37].mxu0 }
0x235e   : > { %6918 = vmatmul.mubr.msk.f32.vlgmr.msra.gmra.mrb[56].mxu1 %vm604_vm1, %v8082_v63 }
0x2363   : > { %v6886_v5 = vpop.f32.mrb[44].mxu0 }
0x2364   : > { %v5426_v11 = vsel %vm5424_vm5, %v6886_v5, -inf  ;;  %v5415_v44 = vpop.f32.mrb[45].mxu0 }
0x2365   : > { %v5425_v14 = vsel %vm5424_vm5, %v5415_v44, -inf }
0x2366   : > { %v5427_v15 = vmax.f32 %v5425_v14, %v5426_v11 }
0x2368   : > { %v5428_v6 = vrot.slane %v5427_v15, 4 }
0x236a   : > { %v5429_v18 = vmax.f32 %v5427_v15, %v5428_v6 }
0x236b   : > { %v6908_v3 = vpop.f32.mrb[46].mxu0 }
0x236c   : > { %v5430_v19 = vrot.slane %v5429_v18, 2  ;;  %v5638_v21 = vsel %vm5424_vm5, %v6908_v3, -inf  ;;  %v5628_v23 = vpop.f32.mrb[47].mxu0 }
0x236d   : > { %v5637_v22 = vsel %vm5424_vm5, %v5628_v23, -inf }
0x236e   : > { %v5431_v34 = vmax.f32 %v5429_v18, %v5430_v19  ;;  %v5639_v35 = vmax.f32 %v5637_v22, %v5638_v21 }
0x2370   : > { %v5432_v24 = vrot.slane %v5431_v34, 1  ;;  %v5640_v12 = vrot.slane %v5639_v35, 4 }
0x2372   : > { %v5433_v25 = vmax.f32 %v5431_v34, %v5432_v24  ;;  %v5641_v26 = vmax.f32 %v5639_v35, %v5640_v12 }
0x2374   : > { %v5434_v20 = vsub.f32 %v5415_v44, %v5433_v25  ;;  %v5435_v1 = vsub.f32 %v6886_v5, %v5433_v25  ;;  %v5642_v27 = vrot.slane %v5641_v26, 2 }
0x2376   : > { %v5436_v29 = vmul.f32 1.442695, %v5434_v20  ;;  %v5438_v31 = vmul.f32 1.442695, %v5435_v1  ;;  %v5643_v30 = vmax.f32 %v5641_v26, %v5642_v27 }
0x2378   : > { %7231 = vpow2.f32 %v5436_v29  ;;  %v5644_v33 = vrot.slane %v5643_v30, 1 }
0x2379   : > { %7233 = vpow2.f32 %v5438_v31 }
0x237a   : > { %v5645_v36 = vmax.f32 %v5643_v30, %v5644_v33 }
0x237c   : > { %v5646_v37 = vsub.f32 %v5628_v23, %v5645_v36  ;;  %v5647_v8 = vsub.f32 %v6908_v3, %v5645_v36 }
0x237e   : > { %v5648_v50 = vmul.f32 1.442695, %v5646_v37  ;;  %v5650_v57 = vmul.f32 1.442695, %v5647_v8 }
0x2380   : > { %7235 = vpow2.f32 %v5648_v50 }
0x2381   : > { %7237 = vpow2.f32 %v5650_v57 }
0x2382   : > { %v7232_v32 = vpop.eup %7231 }
0x2383   : > { %v7234_v56 = vpop.eup %7233  ;;  %v5440_v39 = vsel %vm5424_vm5, %v7232_v32, 0.0 }
0x2384   : > { %v5441_v13 = vsel %vm5424_vm5, %v7234_v56, 0.0 }
0x2385   : > { %v5442_v40 = vadd.f32 %v5441_v13, %v5440_v39 }
0x2387   : > { %v5443_v41 = vrot.slane %v5442_v40, 4 }
0x2389   : > { %v5444_v42 = vadd.f32 %v5443_v41, %v5442_v40 }
0x238a   : > { %v7236_v46 = vpop.eup %7235 }
0x238b   : > { %v7238_v47 = vpop.eup %7237  ;;  %v5445_v62 = vrot.slane %v5444_v42, 2  ;;  %v5652_v4 = vsel %vm5424_vm5, %v7236_v46, 0.0 }
0x238c   : > { %v5653_v48 = vsel %vm5424_vm5, %v7238_v47, 0.0 }
0x238d   : > { %v5654_v10 = vadd.f32 %v5653_v48, %v5652_v4  ;;  %v5446_v16 = vadd.f32 %v5445_v62, %v5444_v42 }
0x238f   : > { %v5655_v49 = vrot.slane %v5654_v10, 4  ;;  %v5447_v51 = vrot.slane %v5446_v16, 1 }
0x2391   : > { %v5656_v52 = vadd.f32 %v5655_v49, %v5654_v10  ;;  %v5448_v53 = vadd.f32 %v5447_v51, %v5446_v16 }
0x2393   : > { %v5657_v38 = vrot.slane %v5656_v52, 2  ;;  %7239 = vrcp.f32 %v5448_v53 }
0x2395   : > { %v5658_v54 = vadd.f32 %v5657_v38, %v5656_v52 }
0x2397   : > { %v5659_v43 = vrot.slane %v5658_v54, 1 }
0x2399   : > { %v5660_v17 = vadd.f32 %v5659_v43, %v5658_v54 }
0x239b   : > { %7241 = vrcp.f32 %v5660_v17 }
0x239d   : > { %v7240_v55 = vpop.eup %7239 }
0x239e   : > { %v5450_v2 = vmul.f32 %v7240_v55, %v7232_v32  ;;  %v5451_v58 = vmul.f32 %v7240_v55, %v7234_v56 }
0x23a0   : > { %5454 = vperm.xlu1 %7142, %v5450_v2  }
0x23a4   : > { %5459 = vperm.xlu1 %7142, %v5451_v58  }
0x23a5   : > { %v7242_v60 = vpop.eup %7241 }
0x23a6   : > { %v5662_v9 = vmul.f32 %v7242_v60, %v7236_v46  ;;  %v5663_v61 = vmul.f32 %v7242_v60, %v7238_v47 }
0x23a8   : > { %5666 = vperm.xlu1 %7142, %v5662_v9  }
0x23ac   : > { %5671 = vperm.xlu1 %7142, %v5663_v61  }
0x241f   : > { %v5455_v24 = vpop.permute.xlu1 %5454 }
0x2420   : > { %v5462_v37 = vmul.f32 %v5455_v24, %v8018_v59 }
0x2422   : > { %v5464_v32 = vsel %vm604_vm1, %v5462_v37, 0.0 }
0x2423   : > { %v5460_v1 = vpop.permute.xlu1 %5459 }
0x2424   : > { %v5463_v33 = vmul.f32 %v5460_v1, %v8034_v45 }
0x2426   : > { %v5465_v8 = vsel %vm604_vm1, %v5463_v33, 0.0 }
0x2427   : > { %v5667_v30 = vpop.permute.xlu1 %5666  ;;  %v5466_v39 = vadd.f32 %v5465_v8, %v5464_v32 }
0x2428   : > { %v5674_v56 = vmul.f32 %v5667_v30, %v8039_v7 }
0x2429   : > { %v5467_v45 = vrot.slane %v5466_v39, 4 }
0x242a   : > { %v5676_v41 = vsel %vm604_vm1, %v5674_v56, 0.0 }
0x242b   : > { %v5672_v36 = vpop.permute.xlu1 %5671  ;;  %v5468_v46 = vadd.f32 %v5467_v45, %v5466_v39 }
0x242c   : > { %v5675_v50 = vmul.f32 %v5672_v36, %v8044_v28 }
0x242d   : > { %v5469_v47 = vrot.slane %v5468_v46, 2 }
0x242e   : > { %v5677_v40 = vsel %vm604_vm1, %v5675_v50, 0.0 }
0x242f   : > { %v5678_v42 = vadd.f32 %v5677_v40, %v5676_v41  ;;  %v5470_v28 = vadd.f32 %v5469_v47, %v5468_v46 }
0x2431   : > { %v5754_v0 = vpop.f32.mrb[56].mxu1  ;;  %v5679_v59 = vrot.slane %v5678_v42, 4  ;;  %v5471_v48 = vrot.slane %v5470_v28, 1 }
0x2432   : > { %7243 = vtanh.f32 %v5754_v0  ;;  %v6919_v5 = vpop.f32.mrb[57].mxu1 }
0x2433   : > { %v5680_v62 = vadd.f32 %v5679_v59, %v5678_v42  ;;  %v5472_v16 = vadd.f32 %v5471_v48, %v5470_v28 }
0x2435   : > { %v5681_v4 = vrot.slane %v5680_v62, 2  ;;  %v5879_v7 = vmul.f32 %v5472_v16, %v5472_v16 }
0x2437   : > { %v5682_v10 = vadd.f32 %v5681_v4, %v5680_v62  ;;  %v5880_v52 = vsel %vm604_vm1, %v5879_v7, 0.0 }
0x2439   : > { %v5683_v49 = vrot.slane %v5682_v10, 1 }
0x243b   : > { %v5684_v51 = vadd.f32 %v5683_v49, %v5682_v10 }
0x243c   : > { %v7244_v11 = vpop.eup %7243 }
0x243d   : > { %6929 = vmatmul.mubr.msk.f32.vlgmr.msra.gmra.mrb[48].mxu0 %vm604_vm1, %v7244_v11  ;;  %v5900_v53 = vmul.f32 %v5684_v51, %v5684_v51 }
0x243f   : > { %v5901_v38 = vsel %vm604_vm1, %v5900_v53, 0.0 }
0x2510   : > { %v5828_v44 = vpop.f32.mrb[48].mxu0 }
0x2511   : > { %v5832_v14 = vsel %vm5424_vm5, %v5828_v44, -inf  ;;  %v6930_v15 = vpop.f32.mrb[49].mxu0 }
0x2512   : > { %v5833_v6 = vrot.slane %v5832_v14, 4 }
0x2514   : > { %v5834_v18 = vmax.f32 %v5832_v14, %v5833_v6 }
0x2516   : > { %v5835_v3 = vrot.slane %v5834_v18, 2 }
0x2518   : > { %v5836_v19 = vmax.f32 %v5834_v18, %v5835_v3 }
0x251a   : > { %v5837_v21 = vrot.slane %v5836_v19, 1 }
0x251c   : > { %v5838_v23 = vmax.f32 %v5836_v19, %v5837_v21 }
0x251e   : > { %v5839_v22 = vsub.f32 %v5828_v44, %v5838_v23 }
0x2520   : > { %v5840_v34 = vmul.f32 1.442695, %v5839_v22 }
0x2522   : > { %7245 = vpow2.f32 %v5840_v34 }
0x252c   : > { %v7246_v35 = vpop.eup %7245 }
0x252d   : > { %v5842_v12 = vsel %vm5424_vm5, %v7246_v35, 0.0 }
0x252e   : > { %v5843_v25 = vrot.slane %v5842_v12, 4 }
0x2530   : > { %v5844_v26 = vadd.f32 %v5843_v25, %v5842_v12 }
0x2532   : > { %v5845_v20 = vrot.slane %v5844_v26, 2 }
0x2534   : > { %v5846_v27 = vadd.f32 %v5845_v20, %v5844_v26 }
0x2536   : > { %v5847_v29 = vrot.slane %v5846_v27, 1 }
0x2538   : > { %v5848_v31 = vadd.f32 %v5847_v29, %v5846_v27 }
0x253a   : > { %7247 = vrcp.f32 %v5848_v31 }
0x2544   : > { %v7248_v57 = vpop.eup %7247 }
0x2545   : > { %v5850_v13 = vmul.f32 %v7248_v57, %v7246_v35 }
0x2547   : > { %5853 = vperm.xlu0 %7141, %v5850_v13  }
0x2566   : > { %5881 = vadd.xlane.f32.xlu0 %v5880_v52 }
0x256a   : > { %5902 = vadd.xlane.f32.xlu0 %v5901_v38 }
0x25c6   : > { %v5854_v54 = vpop.permute.xlu0 %5853 }
0x25c7   : > { %v5856_v43 = vmul.f32 %v5854_v54, %v8082_v63 }
0x25c9   : > { %v5857_v17 = vsel %vm604_vm1, %v5856_v43, 0.0 }
0x25ca   : > { %v5858_v55 = vrot.slane %v5857_v17, 4 }
0x25cc   : > { %v5859_v2 = vadd.f32 %v5858_v55, %v5857_v17 }
0x25ce   : > { %v5860_v58 = vrot.slane %v5859_v2, 2 }
0x25d0   : > { %v5861_v60 = vadd.f32 %v5860_v58, %v5859_v2 }
0x25d2   : > { %v5862_v9 = vrot.slane %v5861_v60, 1 }
0x25d4   : > { %v5863_v61 = vadd.f32 %v5862_v9, %v5861_v60 }
0x25d6   : > { %v5868_v0 = vmul.f32 %v5863_v61, %v5863_v61  ;;  %v5896_v5 = vmul.f32 %v5863_v61, %v5684_v51  ;;  %v5864_v14 = vmul.f32 %v5863_v61, %v5472_v16 }
0x25d8   : > { %v5869_v11 = vsel %vm604_vm1, %v5868_v0, 0.0  ;;  %v5897_v44 = vsel %vm604_vm1, %v5896_v5, 0.0  ;;  %v5865_v15 = vsel %vm604_vm1, %v5864_v14, 0.0 }
0x25d9   : > { %5870 = vadd.xlane.f32.xlu1 %v5869_v11  ;;  %5898 = vadd.xlane.f32.xlu0 %v5897_v44 }
0x25dd   : > { %5866 = vadd.xlane.f32.xlu1 %v5865_v15 }
0x25f3   : > { %v5882_v63 = vpop.xlane.xlu0 %5881 }
0x25f4   : > { %7249 = vrsqrt.f32 %v5882_v63  ;;  %vm5885_vm6 = vcmp.eq.f32.partialorder %v5882_v63, inf  ;;  %v5888_v12 = vand.u32 2147483648, %v5882_v63  ;;  %vm5887_vm9 = vcmp.eq.f32.partialorder %v5882_v63, 0.0 }
0x25f7   : > { %v5903_v6 = vpop.xlane.xlu0 %5902 }
0x25f8   : > { %7251 = vrsqrt.f32 %v5903_v6  ;;  %vm5906_vm7 = vcmp.eq.f32.partialorder %v5903_v6, inf  ;;  %v5909_v25 = vand.u32 2147483648, %v5903_v6  ;;  %vm5908_vm10 = vcmp.eq.f32.partialorder %v5903_v6, 0.0 }
0x25fe   : > { %v7250_v3 = vpop.eup %7249 }
0x25ff   : > { %v5884_v21 = vmul.f32 %v7250_v3, %v5882_v63 }
0x2601   : > { %v5886_v34 = vsel %vm5885_vm6, %v5882_v63, %v5884_v21 }
0x2602   : > { %v7252_v19 = vpop.eup %7251  ;;  %v5889_v29 = vsel %vm5887_vm9, %v5888_v12, %v5886_v34 }
0x2603   : > { %v5905_v23 = vmul.f32 %v7252_v19, %v5903_v6 }
0x2605   : > { %v5907_v35 = vsel %vm5906_vm7, %v5903_v6, %v5905_v23 }
0x2606   : > { %v5910_v1 = vsel %vm5908_vm10, %v5909_v25, %v5907_v35 }
0x2666   : > { %v5871_v18 = vpop.xlane.xlu1 %5870  ;;  %v5899_v57 = vpop.xlane.xlu0 %5898 }
0x2667   : > { %7253 = vrsqrt.f32 %v5871_v18  ;;  %vm5874_vm8 = vcmp.eq.f32.partialorder %v5871_v18, inf  ;;  %v5877_v26 = vand.u32 2147483648, %v5871_v18  ;;  %vm5876_vm11 = vcmp.eq.f32.partialorder %v5871_v18, 0.0 }
0x266a   : > { %v5867_v8 = vpop.xlane.xlu1 %5866 }
0x2671   : > { %v7254_v22 = vpop.eup %7253 }
0x2672   : > { %v5873_v24 = vmul.f32 %v7254_v22, %v5871_v18 }
0x2674   : > { %v5875_v20 = vsel %vm5874_vm8, %v5871_v18, %v5873_v24 }
0x2675   : > { %v5878_v27 = vsel %vm5876_vm11, %v5877_v26, %v5875_v20 }
0x2676   : > { %v5890_v31 = vmul.f32 %v5889_v29, %v5878_v27  ;;  %v5911_v30 = vmul.f32 %v5910_v1, %v5878_v27 }
0x2678   : > { %v5891_v33 = vmax.f32 %v5890_v31, 1e-08  ;;  %v5912_v36 = vmax.f32 %v5911_v30, 1e-08 }
0x267a   : > { %7255 = vrcp.f32 %v5891_v33 }
0x267b   : > { %7257 = vrcp.f32 %v5912_v36 }
0x2684   : > { %v7256_v37 = vpop.eup %7255 }
0x2685   : > { %v7258_v50 = vpop.eup %7257  ;;  %v5893_v32 = vmul.f32 %v7256_v37, %v5867_v8 }
0x2686   : > { %v5914_v56 = vmul.f32 %v7258_v50, %v5899_v57 }
0x2687   : > { %5895 = vst.msk [vmem:[%s577_s18] sm:$0x1] %vm5894_vm12, %v5893_v32 }
0x2688   : > { %5915 = vst.msk [vmem:[%s580_s20] sm:$0x1] %vm5894_vm12, %v5914_v56 }
0x2689 PF: > { %s25_s29 = sadd.s32 1, %s7267_s29  }
0x268a   : > { %p22_p4 = scmp.ge.s32.totalorder %s25_s29, 4  }
0x268c   :  { %24 = sbr.rel (!%p22_p4) target bundleno = 1 (0x1), region = 144 }

</bundles_post_ra>
